<compile_context>
chip_gen: v7x
topology: tpu7x:2x2x1
jax: 0.10.0
libtpu: 0.0.40
codegen_flags: <defaults>
</compile_context>

<pallas_src>
import jax
import jax.numpy as jnp
from jax.experimental import pallas as pl
from jax.experimental.pallas import tpu as pltpu


def _neg_logsigmoid(x):
    # Inputs are pre-clamped to [-10, 10]; log1p(exp(-x)) is stable in f32.
    return jnp.log1p(jnp.exp(-x))


def _round_up(x, m):
    return ((x + m - 1) // m) * m


def _tpu_config():
    """Return (num_tensorcores, per-step block budget bytes, vmem_limit_bytes)."""
    vmem = 128 * 1024 * 1024
    try:
        vmem = int(pltpu.get_tpu_info().vmem_capacity_bytes)
    except Exception:
        pass
    kind = ""
    try:
        kind = jax.devices()[0].device_kind.lower()
    except Exception:
        pass
    is_v7 = "v7" in kind
    if is_v7 or vmem <= 64 * 1024 * 1024:
        # v7x: 64 MiB VMEM per TC, 2 TensorCores per chip sharing HBM.
        return (2 if is_v7 else 1), 20 * 1024 * 1024, 48 * 1024 * 1024
    # v5e / v6e: 128 MiB VMEM, single TensorCore.
    return 1, 40 * 1024 * 1024, 100 * 1024 * 1024


def hg2vec_forward(out_emb, in_emb, pos_u, pos_v, info_v,
                   context_mask, sig_mask, score_mask,
                   *, tile_bl=1024, ncores=None):
    B, L, T = pos_u.shape
    C = pos_v.shape[-1]
    I = info_v.shape[-1]
    D = out_emb.shape[-1]
    BL = B * L
    f32 = jnp.float32
    bf16 = jnp.bfloat16
    assert C <= 128 and I <= 128, "accumulator assumes C, I <= 128"

    auto_cores, budget, vmem_limit = _tpu_config()
    if ncores is None:
        ncores = auto_cores

    # ---- tile sizing: large fused-(b,l) bf16 tiles, bounded so the four
    # double-buffered streaming inputs fit the generation's VMEM budget. ----
    bytes_per_row = (T + 2 * C + I) * D * 2          # bf16 activations
    max_tile = max(16, (budget // (2 * bytes_per_row)) // 16 * 16)
    tile = min(_round_up(tile_bl, 16), max_tile, _round_up(BL, 16))
    tile = max(16, (tile // 16) * 16)

    n_tiles = pl.cdiv(BL, tile)
    if n_tiles < ncores:
        ncores = 1                       # nothing to split across TensorCores
    tpc = pl.cdiv(n_tiles, ncores)       # tiles per core ("arbitrary" axis)
    BL_pad = tile * tpc * ncores
    need_mask = (BL_pad != BL)

    # Accumulator geometry: (SUB, 128) f32 holds the (T,C) and (C,I) partials.
    SUB = _round_up(max(T, C, 8), 8)

    # ---- embedding gathers (XLA glue), streamed to the kernel as bf16.
    # Tables are cast once so the gather writes and the kernel reads both move
    # bf16; context_mask (0/1, exact in bf16) is folded into the gather. ----
    def pad_idx(idx, last):
        return jnp.pad(idx.reshape(BL, last), ((0, BL_pad - BL), (0, 0)))

    pu = pad_idx(pos_u, T)
    pv = pad_idx(pos_v, C)
    pi = pad_idx(info_v, I)

    out_bf = out_emb.astype(bf16)
    in_bf = in_emb.astype(bf16)
    tgt = jnp.take(out_bf, pu, axis=0)                                    # (BL_pad,T,D)
    ctx_in = (jnp.take(in_bf, pv, axis=0)
              * context_mask.astype(bf16)[None, :, None])                 # (BL_pad,C,D)
    ctx_out = jnp.take(out_bf, pv, axis=0)                                # (BL_pad,C,D)
    info_in = jnp.take(in_bf, pi, axis=0)                                 # (BL_pad,I,D)

    sig = sig_mask.reshape(1, I).astype(f32)
    smask = score_mask.reshape(1, I).astype(f32)

    def kernel(tgt_ref, ctx_in_ref, ctx_out_ref, info_in_ref,
               sig_ref, smask_ref, out_ref):
        i = pl.program_id(0)     # core index ("parallel")
        j = pl.program_id(1)     # tile index within core ("arbitrary")

        @pl.when(j == 0)
        def _():
            out_ref[...] = jnp.zeros_like(out_ref)

        # score path: per-(b,l) (T,D) x (C,D)^T contraction, batched over tile.
        score = jnp.einsum('btd,bcd->btc', tgt_ref[...], ctx_in_ref[...],
                           preferred_element_type=f32)
        score = jnp.clip(score, -10.0, 10.0)
        score = _neg_logsigmoid(score)                        # (tile, T, C) f32

        # info path: per-(b,l) (C,D) x (I,D)^T contraction, batched over tile.
        info = jnp.einsum('bcd,bid->bci', ctx_out_ref[...], info_in_ref[...],
                          preferred_element_type=f32)
        info = jnp.clip(info, -10.0, 10.0)
        info = info * sig_ref[...][:, None, :]                # (1,1,I) broadcast
        info = _neg_logsigmoid(info)
        info = info * smask_ref[...][:, None, :]              # (tile, C, I)

        if need_mask:
            # Padded rows gathered embedding row 0; zero their contribution.
            base = (i * tpc + j) * tile
            rows = base + jax.lax.broadcasted_iota(jnp.int32, (tile, 1), 0)
            v3 = (rows < BL).astype(f32)[:, :, None]          # (tile, 1, 1)
            score = score * v3
            info = info * v3

        # Reduce only over the cheap tile axis; fold the (T,C)/(C,I) partials
        # into the lane/sublane-shaped accumulator held in the output block.
        s_tc = jnp.sum(score, axis=0)                         # (T, C)
        i_ci = jnp.sum(info, axis=0)                          # (C, I)
        out_ref[0, :T, :C] += s_tc
        out_ref[0, :C, :I] += i_ci

    row3 = lambda i, j: (i * tpc + j, 0, 0)
    const2 = lambda i, j: (0, 0)

    partials = pl.pallas_call(
        kernel,
        out_shape=jax.ShapeDtypeStruct((ncores, SUB, 128), f32),
        grid_spec=pltpu.PrefetchScalarGridSpec(
            num_scalar_prefetch=0,
            grid=(ncores, tpc),
            in_specs=[
                pl.BlockSpec((tile, T, D), row3),
                pl.BlockSpec((tile, C, D), row3),
                pl.BlockSpec((tile, C, D), row3),
                pl.BlockSpec((tile, I, D), row3),
                pl.BlockSpec((1, I), const2),
                pl.BlockSpec((1, I), const2),
            ],
            out_specs=pl.BlockSpec((1, SUB, 128), lambda i, j: (i, 0, 0)),
        ),
        compiler_params=pltpu.CompilerParams(
            dimension_semantics=("parallel", "arbitrary"),
            vmem_limit_bytes=vmem_limit),
    )(tgt, ctx_in, ctx_out, info_in, sig, smask)

    return jnp.sum(partials)


def hg2vec_reference(out_emb, in_emb, pos_u, pos_v, info_v,
                     context_mask, sig_mask, score_mask):
    """Pure-JAX transcription of the PyTorch forward (eval-mode dropout)."""
    hp = jax.lax.Precision.HIGHEST
    emb_t = out_emb[pos_u]                        # (B,L,T,D)
    emb_ci = in_emb[pos_v] * context_mask[None, None, :, None]
    emb_co = out_emb[pos_v]
    emb_ii = in_emb[info_v]

    score = jnp.einsum('bltd,blcd->bltc', emb_t, emb_ci, precision=hp)
    score = jnp.clip(score, -10.0, 10.0)
    score = jnp.sum(jnp.log1p(jnp.exp(-score)))

    info = jnp.einsum('blcd,blid->blci', emb_co, emb_ii, precision=hp)
    info = jnp.clip(info, -10.0, 10.0)
    info = info * sig_mask[None, None, None, :]
    info = jnp.log1p(jnp.exp(-info))
    info = info * score_mask[None, None, None, :]
    return score + jnp.sum(info)


def _run_case(name, key, emb_size, D, B, L, T, C, I,
              zero_input_emb, tile_bl, ncores=None, rtol=5e-3, atol=1e-2):
    k = jax.random.split(key, 8)
    initrange = 1.0 / D
    out_emb = jax.random.uniform(k[0], (emb_size, D), jnp.float32,
                                 -initrange, initrange)
    if zero_input_emb:
        in_emb = jnp.zeros((emb_size, D), jnp.float32)   # faithful to __init__
    else:
        in_emb = jax.random.uniform(k[1], (emb_size, D), jnp.float32, -0.2, 0.2)

    pos_u = jax.random.randint(k[2], (B, L, T), 0, emb_size, dtype=jnp.int32)
    pos_v = jax.random.randint(k[3], (B, L, C), 0, emb_size, dtype=jnp.int32)
    info_v = jax.random.randint(k[4], (B, L, I), 0, emb_size, dtype=jnp.int32)

    context_mask = jax.random.bernoulli(k[5], 0.7, (C,)).astype(jnp.float32)
    sig_mask = jnp.where(jax.random.bernoulli(k[6], 0.5, (I,)), 1.0, -1.0)
    score_mask = jax.random.bernoulli(k[7], 0.8, (I,)).astype(jnp.float32)

    got = hg2vec_forward(out_emb, in_emb, pos_u, pos_v, info_v,
                         context_mask, sig_mask, score_mask,
                         tile_bl=tile_bl, ncores=ncores)
    got = jax.block_until_ready(got)
    want = hg2vec_reference(out_emb, in_emb, pos_u, pos_v, info_v,
                            context_mask, sig_mask, score_mask)
    assert jnp.allclose(got, want, rtol=rtol, atol=atol), (name, got, want)


if __name__ == "__main__":
    key = jax.random.PRNGKey(0)
    k1, k2 = jax.random.split(key)

    # Case 1: small, init-faithful (input_embeddings == 0), single tile,
    # auto core/tile config.
    _run_case("small", k1, emb_size=64, D=32, B=2, L=2, T=8, C=8, I=8,
              zero_input_emb=True, tile_bl=1024)

    # Case 2: multi-tile accumulation + BL padding + two per-core partial
    # accumulators (forced ncores=2), nonzero tables so both bf16 batched
    # matmuls are exercised.
    _run_case("multi_tile", k2, emb_size=96, D=32, B=4, L=13, T=8, C=16, I=8,
              zero_input_emb=False, tile_bl=16, ncores=2)

    print("KERNEL_OK")
</pallas_src>

<mosaic_0001>
module attributes {stable_mosaic.version = 11 : i64} {
  func.func @kernel(%arg0: i32, %arg1: i32, %arg2: memref<16x8x32xbf16, #tpu.memory_space<vmem>>, %arg3: memref<16x8x32xbf16, #tpu.memory_space<vmem>>, %arg4: memref<16x8x32xbf16, #tpu.memory_space<vmem>>, %arg5: memref<16x8x32xbf16, #tpu.memory_space<vmem>>, %arg6: memref<1x8xf32, #tpu.memory_space<vmem>>, %arg7: memref<1x8xf32, #tpu.memory_space<vmem>>, %arg8: memref<1x8x128xf32, #tpu.memory_space<vmem>>) attributes {dimension_semantics = [#tpu.dimension_semantics<parallel>, #tpu.dimension_semantics<arbitrary>], iteration_bounds = array<i64: 1, 1>, scalar_prefetch = 0 : i64, scratch_operands = 0 : i64, tpu.core_type = #tpu.core_type<tc>, window_params = [{transform_indices = @transform_0, window_bounds = array<i64: 16, 8, 32>}, {transform_indices = @transform_1, window_bounds = array<i64: 16, 8, 32>}, {transform_indices = @transform_2, window_bounds = array<i64: 16, 8, 32>}, {transform_indices = @transform_3, window_bounds = array<i64: 16, 8, 32>}, {pipeline_mode = #tpu.pipeline_mode<synchronous>, transform_indices = @transform_4, window_bounds = array<i64: 1, 8>}, {pipeline_mode = #tpu.pipeline_mode<synchronous>, transform_indices = @transform_5, window_bounds = array<i64: 1, 8>}, {transform_indices = @transform_6, window_bounds = array<i64: 1, 8, 128>}]} {
    %c0_i32 = arith.constant 0 : i32
    %0 = arith.cmpi eq, %arg1, %c0_i32 : i32
    %1 = arith.extui %0 : i1 to i32
    %c0_i32_0 = arith.constant 0 : i32
    %2 = arith.cmpi ne, %1, %c0_i32_0 : i32
    scf.if %2 {
      %cst_37 = arith.constant 0.000000e+00 : f32
      %62 = vector.broadcast %cst_37 : f32 to vector<1x8x128xf32>
      %c0_38 = arith.constant 0 : index
      %c0_39 = arith.constant 0 : index
      %c0_40 = arith.constant 0 : index
      %63 = vector.load %arg8[%c0_38, %c0_39, %c0_40] : memref<1x8x128xf32, #tpu.memory_space<vmem>>, vector<1x8x128xf32>
      tpu.vector_store %arg8[%c0_38, %c0_39, %c0_40], %62 {strides = array<i32>} : memref<1x8x128xf32, #tpu.memory_space<vmem>>, vector<1x8x128xf32>,
    } else {
    }
    %c0 = arith.constant 0 : index
    %c0_1 = arith.constant 0 : index
    %c0_2 = arith.constant 0 : index
    %3 = vector.load %arg2[%c0, %c0_1, %c0_2] : memref<16x8x32xbf16, #tpu.memory_space<vmem>>, vector<16x8x32xbf16>
    %c0_3 = arith.constant 0 : index
    %c0_4 = arith.constant 0 : index
    %c0_5 = arith.constant 0 : index
    %4 = vector.load %arg3[%c0_3, %c0_4, %c0_5] : memref<16x8x32xbf16, #tpu.memory_space<vmem>>, vector<16x8x32xbf16>
    "tpu.trace_start"() <{level = 10 : i32, message = "btd,bcd->btc"}> : () -> ()
    %cst = arith.constant dense<0.000000e+00> : vector<16x8x8xf32>
    %5 = tpu.matmul %3, %4, %cst {dimension_numbers = #tpu.dot_dimension_numbers<[2], [2], [1], [1], [0, 0, 0, 1, 1, 1], [0], [0]>} : vector<16x8x32xbf16>, vector<16x8x32xbf16>, vector<16x8x8xf32> -> vector<16x8x8xf32>
    %cst_6 = arith.constant -1.000000e+01 : f32
    %cst_7 = arith.constant 1.000000e+01 : f32
    "tpu.trace_stop"() : () -> ()
    %6 = vector.broadcast %cst_6 : f32 to vector<16x8x8xf32>
    %7 = arith.maximumf %6, %5 : vector<16x8x8xf32>
    %8 = vector.broadcast %cst_7 : f32 to vector<16x8x8xf32>
    %9 = arith.minimumf %8, %7 : vector<16x8x8xf32>
    %cst_8 = arith.constant 0.000000e+00 : f32
    %10 = vector.broadcast %cst_8 : f32 to vector<16x8x8xf32>
    %11 = arith.subf %10, %9 : vector<16x8x8xf32>
    %12 = math.exp %11 : vector<16x8x8xf32>
    %13 = math.log1p %12 : vector<16x8x8xf32>
    %c0_9 = arith.constant 0 : index
    %c0_10 = arith.constant 0 : index
    %c0_11 = arith.constant 0 : index
    %14 = vector.load %arg4[%c0_9, %c0_10, %c0_11] : memref<16x8x32xbf16, #tpu.memory_space<vmem>>, vector<16x8x32xbf16>
    %c0_12 = arith.constant 0 : index
    %c0_13 = arith.constant 0 : index
    %c0_14 = arith.constant 0 : index
    %15 = vector.load %arg5[%c0_12, %c0_13, %c0_14] : memref<16x8x32xbf16, #tpu.memory_space<vmem>>, vector<16x8x32xbf16>
    "tpu.trace_start"() <{level = 10 : i32, message = "bcd,bid->bci"}> : () -> ()
    %cst_15 = arith.constant dense<0.000000e+00> : vector<16x8x8xf32>
    %16 = tpu.matmul %14, %15, %cst_15 {dimension_numbers = #tpu.dot_dimension_numbers<[2], [2], [1], [1], [0, 0, 0, 1, 1, 1], [0], [0]>} : vector<16x8x32xbf16>, vector<16x8x32xbf16>, vector<16x8x8xf32> -> vector<16x8x8xf32>
    %cst_16 = arith.constant -1.000000e+01 : f32
    %cst_17 = arith.constant 1.000000e+01 : f32
    "tpu.trace_stop"() : () -> ()
    %17 = vector.broadcast %cst_16 : f32 to vector<16x8x8xf32>
    %18 = arith.maximumf %17, %16 : vector<16x8x8xf32>
    %19 = vector.broadcast %cst_17 : f32 to vector<16x8x8xf32>
    %20 = arith.minimumf %19, %18 : vector<16x8x8xf32>
    %c0_18 = arith.constant 0 : index
    %c0_19 = arith.constant 0 : index
    %21 = vector.load %arg6[%c0_18, %c0_19] : memref<1x8xf32, #tpu.memory_space<vmem>>, vector<1x8xf32>
    %22 = vector.shape_cast %21 : vector<1x8xf32> to vector<1x1x8xf32>
    %23 = vector.broadcast %22 : vector<1x1x8xf32> to vector<16x8x8xf32>
    %24 = arith.mulf %20, %23 : vector<16x8x8xf32>
    %cst_20 = arith.constant 0.000000e+00 : f32
    %25 = vector.broadcast %cst_20 : f32 to vector<16x8x8xf32>
    %26 = arith.subf %25, %24 : vector<16x8x8xf32>
    %27 = math.exp %26 : vector<16x8x8xf32>
    %28 = math.log1p %27 : vector<16x8x8xf32>
    %c0_21 = arith.constant 0 : index
    %c0_22 = arith.constant 0 : index
    %29 = vector.load %arg7[%c0_21, %c0_22] : memref<1x8xf32, #tpu.memory_space<vmem>>, vector<1x8xf32>
    %30 = vector.shape_cast %29 : vector<1x8xf32> to vector<1x1x8xf32>
    %31 = vector.broadcast %30 : vector<1x1x8xf32> to vector<16x8x8xf32>
    %32 = arith.mulf %28, %31 : vector<16x8x8xf32>
    %c1_i32 = arith.constant 1 : i32
    %33 = arith.muli %arg0, %c1_i32 : i32
    %34 = arith.addi %33, %arg1 : i32
    %c16_i32 = arith.constant 16 : i32
    %35 = arith.muli %34, %c16_i32 : i32
    %36 = tpu.iota {dimensions = array<i32: 0>} : vector<16x1xi32>
    %37 = vector.broadcast %35 : i32 to vector<16x1xi32>
    %38 = arith.addi %37, %36 : vector<16x1xi32>
    %c4_i32 = arith.constant 4 : i32
    %39 = vector.broadcast %c4_i32 : i32 to vector<16x1xi32>
    %40 = arith.cmpi slt, %38, %39 : vector<16x1xi32>
    %41 = arith.extui %40 : vector<16x1xi1> to vector<16x1xi32>
    %42 = arith.sitofp %41 : vector<16x1xi32> to vector<16x1xf32>
    %43 = vector.shape_cast %42 : vector<16x1xf32> to vector<16x1x1xf32>
    %44 = vector.broadcast %43 : vector<16x1x1xf32> to vector<16x8x8xf32>
    %45 = arith.mulf %13, %44 : vector<16x8x8xf32>
    %46 = vector.broadcast %43 : vector<16x1x1xf32> to vector<16x8x8xf32>
    %47 = arith.mulf %32, %46 : vector<16x8x8xf32>
    %cst_23 = arith.constant dense<0.000000e+00> : vector<8x8xf32>
    %48 = vector.multi_reduction <add>, %45, %cst_23 [0] : vector<16x8x8xf32> to vector<8x8xf32>
    %cst_24 = arith.constant dense<0.000000e+00> : vector<8x8xf32>
    %49 = vector.multi_reduction <add>, %47, %cst_24 [0] : vector<16x8x8xf32> to vector<8x8xf32>
    %c0_25 = arith.constant 0 : index
    %c0_26 = arith.constant 0 : index
    %c0_27 = arith.constant 0 : index
    %50 = vector.load %arg8[%c0_25, %c0_26, %c0_27] : memref<1x8x128xf32, #tpu.memory_space<vmem>>, vector<1x8x8xf32>
    %51 = vector.shape_cast %50 : vector<1x8x8xf32> to vector<8x8xf32>
    %52 = arith.addf %51, %48 : vector<8x8xf32>
    %c0_28 = arith.constant 0 : index
    %c0_29 = arith.constant 0 : index
    %c0_30 = arith.constant 0 : index
    %53 = vector.load %arg8[%c0_28, %c0_29, %c0_30] : memref<1x8x128xf32, #tpu.memory_space<vmem>>, vector<1x8x8xf32>
    %54 = vector.shape_cast %53 : vector<1x8x8xf32> to vector<8x8xf32>
    %55 = vector.shape_cast %52 : vector<8x8xf32> to vector<1x8x8xf32>
    tpu.vector_store %arg8[%c0_28, %c0_29, %c0_30], %55 {strides = array<i32>} : memref<1x8x128xf32, #tpu.memory_space<vmem>>, vector<1x8x8xf32>,
    %c0_31 = arith.constant 0 : index
    %c0_32 = arith.constant 0 : index
    %c0_33 = arith.constant 0 : index
    %56 = vector.load %arg8[%c0_31, %c0_32, %c0_33] : memref<1x8x128xf32, #tpu.memory_space<vmem>>, vector<1x8x8xf32>
    %57 = vector.shape_cast %56 : vector<1x8x8xf32> to vector<8x8xf32>
    %58 = arith.addf %57, %49 : vector<8x8xf32>
    %c0_34 = arith.constant 0 : index
    %c0_35 = arith.constant 0 : index
    %c0_36 = arith.constant 0 : index
    %59 = vector.load %arg8[%c0_34, %c0_35, %c0_36] : memref<1x8x128xf32, #tpu.memory_space<vmem>>, vector<1x8x8xf32>
    %60 = vector.shape_cast %59 : vector<1x8x8xf32> to vector<8x8xf32>
    %61 = vector.shape_cast %58 : vector<8x8xf32> to vector<1x8x8xf32>
    tpu.vector_store %arg8[%c0_34, %c0_35, %c0_36], %61 {strides = array<i32>} : memref<1x8x128xf32, #tpu.memory_space<vmem>>, vector<1x8x8xf32>,
    return
  }
  func.func @transform_0(%arg0: i32, %arg1: i32) -> (i32, i32, i32) {
    %c1_i32 = arith.constant 1 : i32
    %0 = arith.muli %arg0, %c1_i32 : i32
    %1 = arith.addi %0, %arg1 : i32
    %c0_i32 = arith.constant 0 : i32
    %c0_i32_0 = arith.constant 0 : i32
    %c0_i32_1 = arith.constant 0 : i32
    return %1, %c0_i32, %c0_i32_0 : i32, i32, i32
  }
  func.func @transform_1(%arg0: i32, %arg1: i32) -> (i32, i32, i32) {
    %c1_i32 = arith.constant 1 : i32
    %0 = arith.muli %arg0, %c1_i32 : i32
    %1 = arith.addi %0, %arg1 : i32
    %c0_i32 = arith.constant 0 : i32
    %c0_i32_0 = arith.constant 0 : i32
    %c0_i32_1 = arith.constant 0 : i32
    return %1, %c0_i32, %c0_i32_0 : i32, i32, i32
  }
  func.func @transform_2(%arg0: i32, %arg1: i32) -> (i32, i32, i32) {
    %c1_i32 = arith.constant 1 : i32
    %0 = arith.muli %arg0, %c1_i32 : i32
    %1 = arith.addi %0, %arg1 : i32
    %c0_i32 = arith.constant 0 : i32
    %c0_i32_0 = arith.constant 0 : i32
    %c0_i32_1 = arith.constant 0 : i32
    return %1, %c0_i32, %c0_i32_0 : i32, i32, i32
  }
  func.func @transform_3(%arg0: i32, %arg1: i32) -> (i32, i32, i32) {
    %c1_i32 = arith.constant 1 : i32
    %0 = arith.muli %arg0, %c1_i32 : i32
    %1 = arith.addi %0, %arg1 : i32
    %c0_i32 = arith.constant 0 : i32
    %c0_i32_0 = arith.constant 0 : i32
    %c0_i32_1 = arith.constant 0 : i32
    return %1, %c0_i32, %c0_i32_0 : i32, i32, i32
  }
  func.func @transform_4(%arg0: i32, %arg1: i32) -> (i32, i32) {
    %c0_i32 = arith.constant 0 : i32
    %c0_i32_0 = arith.constant 0 : i32
    %c0_i32_1 = arith.constant 0 : i32
    return %c0_i32, %c0_i32_0 : i32, i32
  }
  func.func @transform_5(%arg0: i32, %arg1: i32) -> (i32, i32) {
    %c0_i32 = arith.constant 0 : i32
    %c0_i32_0 = arith.constant 0 : i32
    %c0_i32_1 = arith.constant 0 : i32
    return %c0_i32, %c0_i32_0 : i32, i32
  }
  func.func @transform_6(%arg0: i32, %arg1: i32) -> (i32, i32, i32) {
    %c0_i32 = arith.constant 0 : i32
    %c0_i32_0 = arith.constant 0 : i32
    %c0_i32_1 = arith.constant 0 : i32
    return %arg0, %c0_i32, %c0_i32_0 : i32, i32, i32
  }
}

</mosaic_0001>

<bundles_post_ra>
// kernel: tpu_custom_call.1
= control target key start
LH: loop header
LB: loop body
LE: loop exit
PB: predicated region body
PF: predicated region fallthrough
CT: control target
= control target key end

     0   :  { %11 = vsyncpa [#allocation3], 0  ;;  %s3932_s0 = inlined_call_operand.hbm [shape: bf16[16,8,32], index: 0, kind: input, shape index: {}]   ;;  %s3933_s1 = inlined_call_operand.hbm [shape: bf16[16,8,32], index: 1, kind: input, shape index: {}]   ;;  %s3934_s2 = inlined_call_operand.hbm [shape: bf16[16,8,32], index: 2, kind: input, shape index: {}]   ;;  %s3935_s3 = inlined_call_operand.hbm [shape: bf16[16,8,32], index: 3, kind: input, shape index: {}]   ;;  %s3936_s4 = inlined_call_operand.hbm [shape: f32[1,8], index: 4, kind: input, shape index: {}]   ;;  %s3937_s5 = inlined_call_operand.hbm [shape: f32[1,8], index: 5, kind: input, shape index: {}]   ;;  %s3938_s6 = inlined_call_operand.hbm [shape: f32[1,8,128], index: 6, kind: output, shape index: {}]  }
   0x1   :  { %12 = vsyncpa [#allocation6], 0 }
   0x2   :  { %13 = vsyncpa [#allocation9], 0 }
   0x3   :  { %14 = vsyncpa [#allocation12], 0 }
   0x4   :  { %15 = vsyncpa [#allocation4], 0  ;;  %s3005_s21 = smov [#allocation5]   ;;  %s3006_s23 = smov [#allocation8]  }
   0x5   :  { %s41_s22 = sshll.u32 %s3005_s21, 4  ;;  %s73_s24 = sshll.u32 %s3006_s23, 4  ;;  %s42_s22 = int_to_ptr.vmem [resolvable:$true] %s41_s22  ;;  %s3051_s24 = int_to_ptr.vmem [resolvable:$true] %s73_s24 }
   0x6   :  { %s2841_s27 = scalar_lea.hbm %s3933_s1, 1024 }
   0x7   :  { %p2842_p0 = scmp.ne.s32.totalorder %s3933_s1, %s2841_s27  ;;  %p2845_p1 = scmp.lt.u32.totalorder %s2841_s27, %s3933_s1 }
   0x9   :  { %p2847_p2 = pnand %p2845_p1, %p2842_p0 }
   0xb   :  { %2850 = shalt.err (!%p2847_p2)
}
   0xc   :  { %s2851_s8 = scalar_lea.vmem %s42_s22, 1024  ;;  %p2856_p4 = scmp.lt.s32.totalorder %s42_s22, %s42_s22 }
   0xd   :  { %p2852_p3 = scmp.ne.s32.totalorder %s42_s22, %s2851_s8  ;;  %p2857_p5 = scmp.lt.s32.totalorder %s2851_s8, %s2851_s8 }
   0xf   :  { %p2858_p6 = por %p2857_p5, %p2856_p4 }
  0x11   :  { %p2859_p7 = pnand %p2858_p6, %p2852_p3 }
  0x13   :  { %2862 = shalt.err (!%p2859_p7)
}
  0x14   :  { %s3007_s9 = smov 64   ;;  %s3008_s10 = smov 4  }
  0x15   :  { %47 = dma.hbm_to_vmem [thread:$0]  %s3933_s1, 1024, %s42_s22, [#allocation6], %s3007_s9, %s3007_s9, %s3008_s10  }
  0x16   :  { %s2863_s15 = scalar_lea.hbm %s3935_s3, 1024 }
  0x17   :  { %p2864_p8 = scmp.ne.s32.totalorder %s3935_s3, %s2863_s15  ;;  %p2867_p9 = scmp.lt.u32.totalorder %s2863_s15, %s3935_s3 }
  0x19   :  { %p2869_p10 = pnand %p2867_p9, %p2864_p8 }
  0x1b   :  { %2872 = shalt.err (!%p2869_p10)
}
  0x1c   :  { %s2873_s20 = scalar_lea.vmem %s3051_s24, 1024  ;;  %p2878_p12 = scmp.lt.s32.totalorder %s3051_s24, %s3051_s24 }
  0x1d   :  { %p2874_p11 = scmp.ne.s32.totalorder %s3051_s24, %s2873_s20  ;;  %p2879_p13 = scmp.lt.s32.totalorder %s2873_s20, %s2873_s20 }
  0x1f   :  { %p2880_p0 = por %p2879_p13, %p2878_p12 }
  0x21   :  { %p2881_p1 = pnand %p2880_p0, %p2874_p11 }
  0x23   :  { %2884 = shalt.err (!%p2881_p1)
}
  0x24   :  { %79 = dma.hbm_to_vmem [thread:$0]  %s3935_s3, 1024, %s3051_s24, [#allocation9], %s3007_s9, %s3007_s9, %s3008_s10  }
  0x25   :  { %s3009_s22 = smov [#allocation2]   ;;  %s3010_s25 = smov [#allocation7]  }
  0x26   :  { %s25_s23 = sshll.u32 %s3009_s22, 4  ;;  %s57_s26 = sshll.u32 %s3010_s25, 4  ;;  %s26_s23 = int_to_ptr.vmem [resolvable:$true] %s25_s23  ;;  %s3088_s26 = int_to_ptr.vmem [resolvable:$true] %s57_s26 }
  0x27   :  { %s2885_s29 = scalar_lea.hbm %s3932_s0, 1024 }
  0x28   :  { %p2886_p2 = scmp.ne.s32.totalorder %s3932_s0, %s2885_s29  ;;  %p2889_p3 = scmp.lt.u32.totalorder %s2885_s29, %s3932_s0 }
  0x2a   :  { %p2891_p4 = pnand %p2889_p3, %p2886_p2 }
  0x2c   :  { %2894 = shalt.err (!%p2891_p4)
}
  0x2d   :  { %s2895_s3 = scalar_lea.vmem %s26_s23, 1024  ;;  %p2900_p6 = scmp.lt.s32.totalorder %s26_s23, %s26_s23 }
  0x2e   :  { %p2896_p5 = scmp.ne.s32.totalorder %s26_s23, %s2895_s3  ;;  %p2901_p7 = scmp.lt.s32.totalorder %s2895_s3, %s2895_s3 }
  0x30   :  { %p2902_p8 = por %p2901_p7, %p2900_p6 }
  0x32   :  { %p2903_p9 = pnand %p2902_p8, %p2896_p5 }
  0x34   :  { %2906 = shalt.err (!%p2903_p9)
}
  0x35   :  { %31 = dma.hbm_to_vmem [thread:$0]  %s3932_s0, 1024, %s26_s23, [#allocation3], %s3007_s9, %s3007_s9, %s3008_s10  }
  0x36   :  { %s2907_s15 = scalar_lea.hbm %s3934_s2, 1024 }
  0x37   :  { %p2908_p10 = scmp.ne.s32.totalorder %s3934_s2, %s2907_s15  ;;  %p2911_p11 = scmp.lt.u32.totalorder %s2907_s15, %s3934_s2 }
  0x39   :  { %p2913_p12 = pnand %p2911_p11, %p2908_p10 }
  0x3b   :  { %2916 = shalt.err (!%p2913_p12)
}
  0x3c   :  { %s2917_s20 = scalar_lea.vmem %s3088_s26, 1024  ;;  %p2922_p0 = scmp.lt.s32.totalorder %s3088_s26, %s3088_s26 }
  0x3d   :  { %p2918_p13 = scmp.ne.s32.totalorder %s3088_s26, %s2917_s20  ;;  %p2923_p1 = scmp.lt.s32.totalorder %s2917_s20, %s2917_s20 }
  0x3f   :  { %p2924_p2 = por %p2923_p1, %p2922_p0 }
  0x41   :  { %p2925_p3 = pnand %p2924_p2, %p2918_p13 }
  0x43   :  { %2928 = shalt.err (!%p2925_p3)
}
  0x44   :  { %63 = dma.hbm_to_vmem [thread:$0]  %s3934_s2, 1024, %s3088_s26, [#allocation6], %s3007_s9, %s3007_s9, %s3008_s10  }
  0x45   :  { %s3011_s21 = smov [#allocation10]   ;;  %s3012_s23 = smov [#allocation11]  }
  0x46   :  { %s86_s22 = sshll.u32 %s3011_s21, 4  ;;  %s96_s25 = sshll.u32 %s3012_s23, 4  ;;  %s87_s22 = int_to_ptr.vmem [resolvable:$true] %s86_s22  ;;  %s97_s25 = int_to_ptr.vmem [resolvable:$true] %s96_s25 }
  0x47   :  { %s2929_s29 = scalar_lea.hbm %s3936_s4, 16 }
  0x48   :  { %p2930_p4 = scmp.ne.s32.totalorder %s3936_s4, %s2929_s29  ;;  %p2933_p5 = scmp.lt.u32.totalorder %s2929_s29, %s3936_s4 }
  0x4a   :  { %p2935_p6 = pnand %p2933_p5, %p2930_p4 }
  0x4c   :  { %2938 = shalt.err (!%p2935_p6)
}
  0x4d   :  { %s2939_s2 = scalar_lea.vmem %s87_s22, 16  ;;  %s2943_s9 = scalar_lea.vmem %s87_s22, 32 }
  0x4e   :  { %p2940_p7 = scmp.ne.s32.totalorder %s87_s22, %s2939_s2  ;;  %p2944_p8 = scmp.lt.s32.totalorder %s87_s22, %s87_s22 }
  0x4f   :  { %p2945_p9 = scmp.lt.s32.totalorder %s2943_s9, %s2939_s2 }
  0x51   :  { %p2946_p10 = por %p2945_p9, %p2944_p8 }
  0x53   :  { %p2947_p11 = pnand %p2946_p10, %p2940_p7 }
  0x55   :  { %2950 = shalt.err (!%p2947_p11)
}
  0x56   :  { %89 = dma.hbm_to_vmem [thread:$0]  %s3936_s4, 16, %s87_s22, [#allocation9]  }
  0x57   :  { %s2951_s12 = scalar_lea.hbm %s3937_s5, 16 }
  0x58   :  { %p2952_p12 = scmp.ne.s32.totalorder %s3937_s5, %s2951_s12  ;;  %p2955_p13 = scmp.lt.u32.totalorder %s2951_s12, %s3937_s5 }
  0x5a   :  { %p2957_p0 = pnand %p2955_p13, %p2952_p12 }
  0x5c   :  { %2960 = shalt.err (!%p2957_p0)
}
  0x5d   :  { %s2961_s17 = scalar_lea.vmem %s97_s25, 16  ;;  %s2965_s18 = scalar_lea.vmem %s97_s25, 32 }
  0x5e   :  { %p2962_p1 = scmp.ne.s32.totalorder %s97_s25, %s2961_s17  ;;  %p2966_p2 = scmp.lt.s32.totalorder %s97_s25, %s97_s25 }
  0x5f   :  { %p2967_p3 = scmp.lt.s32.totalorder %s2965_s18, %s2961_s17 }
  0x61   :  { %p2968_p4 = por %p2967_p3, %p2966_p2 }
  0x63   :  { %p2969_p5 = pnand %p2968_p4, %p2962_p1 }
  0x65   :  { %2972 = shalt.err (!%p2969_p5)
}
  0x66   :  { %99 = dma.hbm_to_vmem [thread:$0]  %s3937_s5, 16, %s97_s25, [#allocation12]  }
  0x67   :  { %2995 = dma.done.wait [#allocation3], 1024  }
  0x68   :  { %2996 = vsyncadd [#allocation3], 4294966272 }
  0x69   :  { %2997 = dma.done.wait [#allocation6], 2048  }
  0x6a   :  { %2998 = vsyncadd [#allocation6], 4294965248 }
  0x6b   :  { %2999 = dma.done.wait [#allocation9], 1040  }
  0x6c   :  { %3000 = vsyncadd [#allocation9], 4294966256 }
  0x6d   :  { %3001 = dma.done.wait [#allocation12], 16  }
  0x6e   :  { %3002 = vsyncadd [#allocation12], 4294967280  ;;  %v3013_v0 = vmov 0.0   ;;  %vm3014_vm0 = vmmov 0   ;;  %vm164_vm1 = vcmask 261120   ;;  %vm2291_vm3 = vcmask 64512  }
  0x6f   :  { %2509 = vmatprep.subr.bf16.mxu0 %v3013_v0  ;;  %131 = vst [vmem:[#allocation13] sm:$0xff] %v3013_v0  ;;  %2515 = vmatprep.subr.bf16.mxu1 %v3013_v0  ;;  %v148_v1 = vld [vmem:[#allocation5] sm:$0xf]  ;;  %v149_v2 = vld [vmem:[#allocation5 + $0x4] sm:$0xf]  ;;  %s3015_s5 = smov [#allocation13]  }
  0x70   :  { %2511 = vmatprep.mubr.msk.bf16.mxu0 %vm3014_vm0, %v3013_v0  ;;  %2517 = vmatprep.mubr.msk.bf16.mxu1 %vm3014_vm0, %v3013_v0  ;;  %v169_v3 = vsel %vm164_vm1, %v148_v1, 0  ;;  %v215_v4 = vsel %vm164_vm1, %v149_v2, 0  ;;  %v150_v5 = vld [vmem:[#allocation5 + $0x8] sm:$0xf]  ;;  %v151_v6 = vld [vmem:[#allocation5 + $0xc] sm:$0xf] }
  0x71   :  { %2510 = vmatpush3.bf16.xpose.msra.mxu0 %v169_v3  ;;  %2516 = vmatpush3.bf16.xpose.msra.mxu1 %v215_v4  ;;  %v132_v7 = vld [vmem:[#allocation2] sm:$0xf]  ;;  %v133_v8 = vld [vmem:[#allocation2 + $0x4] sm:$0xf]  ;;  %v261_v9 = vsel %vm164_vm1, %v150_v5, 0  ;;  %v307_v10 = vsel %vm164_vm1, %v151_v6, 0 }
  0x72   :  { %2521 = vmatprep.subr.bf16.mxu0 %v3013_v0  ;;  %2527 = vmatprep.subr.bf16.mxu1 %v3013_v0  ;;  %v152_v11 = vld [vmem:[#allocation5 + $0x10] sm:$0xf]  ;;  %v153_v12 = vld [vmem:[#allocation5 + $0x14] sm:$0xf]  ;;  %v134_v13 = vld [vmem:[#allocation2 + $0x8] sm:$0xf] }
  0x73   :  { %v135_v14 = vld [vmem:[#allocation2 + $0xc] sm:$0xf]  ;;  %v353_v15 = vsel %vm164_vm1, %v152_v11, 0  ;;  %v399_v16 = vsel %vm164_vm1, %v153_v12, 0  ;;  %v154_v17 = vld [vmem:[#allocation5 + $0x18] sm:$0xf] }
  0x74   :  { %v155_v18 = vld [vmem:[#allocation5 + $0x1c] sm:$0xf]  ;;  %v136_v19 = vld [vmem:[#allocation2 + $0x10] sm:$0xf]  ;;  %v137_v20 = vld [vmem:[#allocation2 + $0x14] sm:$0xf] }
  0x75   :  { %v445_v21 = vsel %vm164_vm1, %v154_v17, 0  ;;  %v491_v22 = vsel %vm164_vm1, %v155_v18, 0  ;;  %v156_v23 = vld [vmem:[#allocation5 + $0x20] sm:$0xf]  ;;  %v157_v24 = vld [vmem:[#allocation5 + $0x24] sm:$0xf] }
  0x76   :  { %v138_v25 = vld [vmem:[#allocation2 + $0x18] sm:$0xf]  ;;  %v139_v26 = vld [vmem:[#allocation2 + $0x1c] sm:$0xf]  ;;  %v537_v27 = vsel %vm164_vm1, %v156_v23, 0  ;;  %v583_v28 = vsel %vm164_vm1, %v157_v24, 0 }
  0x77   :  { %v158_v29 = vld [vmem:[#allocation5 + $0x28] sm:$0xf]  ;;  %v159_v30 = vld [vmem:[#allocation5 + $0x2c] sm:$0xf]  ;;  %v140_v31 = vld [vmem:[#allocation2 + $0x20] sm:$0xf] }
  0x78   :  { %2512 = vmatmul.mubr.msk.bf16.vlgmr.msra.gmra.mrb[0].mxu0 %vm164_vm1, %v132_v7  ;;  %2518 = vmatmul.mubr.msk.bf16.vlgmr.msra.gmra.mrb[0].mxu1 %vm164_vm1, %v133_v8  ;;  %v141_v32 = vld [vmem:[#allocation2 + $0x24] sm:$0xf]  ;;  %v629_v33 = vsel %vm164_vm1, %v158_v29, 0  ;;  %v675_v34 = vsel %vm164_vm1, %v159_v30, 0  ;;  %v160_v35 = vld [vmem:[#allocation5 + $0x30] sm:$0xf] }
  0x79   :  { %2522 = vmatpush3.bf16.xpose.msra.mxu0 %v261_v9  ;;  %2528 = vmatpush3.bf16.xpose.msra.mxu1 %v307_v10  ;;  %v161_v36 = vld [vmem:[#allocation5 + $0x34] sm:$0xf]  ;;  %v142_v37 = vld [vmem:[#allocation2 + $0x28] sm:$0xf]  ;;  %v143_v38 = vld [vmem:[#allocation2 + $0x2c] sm:$0xf] }
  0x7a   :  { %2523 = vmatprep.mubr.msk.bf16.mxu0 %vm3014_vm0, %v3013_v0  ;;  %2529 = vmatprep.mubr.msk.bf16.mxu1 %vm3014_vm0, %v3013_v0  ;;  %v721_v39 = vsel %vm164_vm1, %v160_v35, 0  ;;  %v767_v40 = vsel %vm164_vm1, %v161_v36, 0  ;;  %v162_v41 = vld [vmem:[#allocation5 + $0x38] sm:$0xf]  ;;  %v163_v42 = vld [vmem:[#allocation5 + $0x3c] sm:$0xf] }
  0x7b   :  { %2533 = vmatprep.subr.bf16.mxu0 %v3013_v0  ;;  %2539 = vmatprep.subr.bf16.mxu1 %v3013_v0  ;;  %v144_v43 = vld [vmem:[#allocation2 + $0x30] sm:$0xf]  ;;  %v145_v44 = vld [vmem:[#allocation2 + $0x34] sm:$0xf]  ;;  %v813_v45 = vsel %vm164_vm1, %v162_v41, 0  ;;  %v859_v46 = vsel %vm164_vm1, %v163_v42, 0 }
  0x7c   :  { %v1141_v47 = vld [vmem:[#allocation8] sm:$0xf]  ;;  %v1142_v48 = vld [vmem:[#allocation8 + $0x4] sm:$0xf]  ;;  %v146_v49 = vld [vmem:[#allocation2 + $0x38] sm:$0xf] }
  0x7d   :  { %v147_v50 = vld [vmem:[#allocation2 + $0x3c] sm:$0xf]  ;;  %v1161_v51 = vsel %vm164_vm1, %v1141_v47, 0  ;;  %v1207_v52 = vsel %vm164_vm1, %v1142_v48, 0  ;;  %v1143_v53 = vld [vmem:[#allocation8 + $0x8] sm:$0xf] }
  0x7e   :  { %v1144_v54 = vld [vmem:[#allocation8 + $0xc] sm:$0xf]  ;;  %v1125_v55 = vld [vmem:[#allocation7] sm:$0xf]  ;;  %v1126_v56 = vld [vmem:[#allocation7 + $0x4] sm:$0xf] }
  0x7f   :  { %v1253_v57 = vsel %vm164_vm1, %v1143_v53, 0  ;;  %v1299_v58 = vsel %vm164_vm1, %v1144_v54, 0  ;;  %v1145_v59 = vld [vmem:[#allocation8 + $0x10] sm:$0xf]  ;;  %v1146_v60 = vld [vmem:[#allocation8 + $0x14] sm:$0xf] }
  0x80   :  { %2524 = vmatmul.mubr.msk.bf16.vlgmr.msra.gmra.mrb[4].mxu0 %vm164_vm1, %v134_v13  ;;  %2530 = vmatmul.mubr.msk.bf16.vlgmr.msra.gmra.mrb[4].mxu1 %vm164_vm1, %v135_v14  ;;  %v1127_v61 = vld [vmem:[#allocation7 + $0x8] sm:$0xf]  ;;  %v1128_v62 = vld [vmem:[#allocation7 + $0xc] sm:$0xf]  ;;  %v1345_v63 = vsel %vm164_vm1, %v1145_v59, 0  ;;  %v1391_v1 = vsel %vm164_vm1, %v1146_v60, 0 }
  0x81   :  { %2534 = vmatpush3.bf16.xpose.msra.mxu0 %v353_v15  ;;  %2540 = vmatpush3.bf16.xpose.msra.mxu1 %v399_v16  ;;  %v1147_v2 = vld [vmem:[#allocation8 + $0x18] sm:$0xf]  ;;  %v1148_v3 = vld [vmem:[#allocation8 + $0x1c] sm:$0xf]  ;;  %v1129_v4 = vld [vmem:[#allocation7 + $0x10] sm:$0xf] }
  0x82   :  { %2535 = vmatprep.mubr.msk.bf16.mxu0 %vm3014_vm0, %v3013_v0  ;;  %2541 = vmatprep.mubr.msk.bf16.mxu1 %vm3014_vm0, %v3013_v0  ;;  %v1130_v5 = vld [vmem:[#allocation7 + $0x14] sm:$0xf]  ;;  %v1437_v6 = vsel %vm164_vm1, %v1147_v2, 0  ;;  %v1483_v7 = vsel %vm164_vm1, %v1148_v3, 0  ;;  %v1149_v8 = vld [vmem:[#allocation8 + $0x20] sm:$0xf] }
  0x83   :  { %2545 = vmatprep.subr.bf16.mxu0 %v3013_v0  ;;  %2551 = vmatprep.subr.bf16.mxu1 %v3013_v0  ;;  %v1150_v9 = vld [vmem:[#allocation8 + $0x24] sm:$0xf]  ;;  %v1131_v10 = vld [vmem:[#allocation7 + $0x18] sm:$0xf]  ;;  %v1132_v11 = vld [vmem:[#allocation7 + $0x1c] sm:$0xf] }
  0x84   :  { %v1529_v12 = vsel %vm164_vm1, %v1149_v8, 0  ;;  %v1575_v13 = vsel %vm164_vm1, %v1150_v9, 0  ;;  %v1151_v14 = vld [vmem:[#allocation8 + $0x28] sm:$0xf]  ;;  %v1152_v15 = vld [vmem:[#allocation8 + $0x2c] sm:$0xf] }
  0x85   :  { %v1133_v16 = vld [vmem:[#allocation7 + $0x20] sm:$0xf]  ;;  %v1134_v17 = vld [vmem:[#allocation7 + $0x24] sm:$0xf]  ;;  %v1621_v18 = vsel %vm164_vm1, %v1151_v14, 0  ;;  %s2366_s20 = sshll.u32 %s3015_s5, 4  ;;  %s2367_s20 = int_to_ptr.vmem [resolvable:$true] %s2366_s20 }
  0x86   :  { %v1136_v23 = vld [vmem:[#allocation7 + $0x2c] sm:$0xf]  ;;  %v1138_v29 = vld [vmem:[#allocation7 + $0x34] sm:$0xf]  ;;  %s2973_s0 = scalar_lea.vmem %s2367_s20, 128  ;;  %p2978_p7 = scmp.lt.s32.totalorder %s2367_s20, %s2367_s20 }
  0x87   :  { %p2974_p6 = scmp.ne.s32.totalorder %s2367_s20, %s2973_s0  ;;  %p2979_p8 = scmp.lt.s32.totalorder %s2973_s0, %s2973_s0 }
  0x88   :  { %2536 = vmatmul.mubr.msk.bf16.vlgmr.msra.gmra.mrb[8].mxu0 %vm164_vm1, %v136_v19  ;;  %2542 = vmatmul.mubr.msk.bf16.vlgmr.msra.gmra.mrb[8].mxu1 %vm164_vm1, %v137_v20  ;;  %v1667_v19 = vsel %vm164_vm1, %v1152_v15, 0  ;;  %v1153_v20 = vld [vmem:[#allocation8 + $0x30] sm:$0xf] }
  0x89   :  { %2546 = vmatpush3.bf16.xpose.msra.mxu0 %v445_v21  ;;  %2552 = vmatpush3.bf16.xpose.msra.mxu1 %v491_v22  ;;  %v1154_v21 = vld [vmem:[#allocation8 + $0x34] sm:$0xf]  ;;  %v1135_v22 = vld [vmem:[#allocation7 + $0x28] sm:$0xf]  ;;  %v1713_v24 = vsel %vm164_vm1, %v1153_v20, 0  ;;  %p2980_p9 = por %p2979_p8, %p2978_p7 }
  0x8a   :  { %2547 = vmatprep.mubr.msk.bf16.mxu0 %vm3014_vm0, %v3013_v0  ;;  %2553 = vmatprep.mubr.msk.bf16.mxu1 %vm3014_vm0, %v3013_v0 }
  0x8b   :  { %2557 = vmatprep.subr.bf16.mxu0 %v3013_v0  ;;  %2563 = vmatprep.subr.bf16.mxu1 %v3013_v0  ;;  %p2981_p10 = pnand %p2980_p9, %p2974_p6 }
  0x90   :  { %2548 = vmatmul.mubr.msk.bf16.vlgmr.msra.gmra.mrb[12].mxu0 %vm164_vm1, %v138_v25  ;;  %2554 = vmatmul.mubr.msk.bf16.vlgmr.msra.gmra.mrb[12].mxu1 %vm164_vm1, %v139_v26  ;;  %v1759_v25 = vsel %vm164_vm1, %v1154_v21, 0  ;;  %v1155_v26 = vld [vmem:[#allocation8 + $0x38] sm:$0xf] }
  0x91   :  { %2558 = vmatpush3.bf16.xpose.msra.mxu0 %v537_v27  ;;  %2564 = vmatpush3.bf16.xpose.msra.mxu1 %v583_v28  ;;  %v1156_v27 = vld [vmem:[#allocation8 + $0x3c] sm:$0xf]  ;;  %v1137_v28 = vld [vmem:[#allocation7 + $0x30] sm:$0xf]  ;;  %v1805_v30 = vsel %vm164_vm1, %v1155_v26, 0 }
  0x92   :  { %2559 = vmatprep.mubr.msk.bf16.mxu0 %vm3014_vm0, %v3013_v0  ;;  %2565 = vmatprep.mubr.msk.bf16.mxu1 %vm3014_vm0, %v3013_v0 }
  0x93   :  { %2569 = vmatprep.subr.bf16.mxu0 %v3013_v0  ;;  %2575 = vmatprep.subr.bf16.mxu1 %v3013_v0 }
  0x98   :  { %2560 = vmatmul.mubr.msk.bf16.vlgmr.msra.gmra.mrb[16].mxu0 %vm164_vm1, %v140_v31  ;;  %2566 = vmatmul.mubr.msk.bf16.vlgmr.msra.gmra.mrb[16].mxu1 %vm164_vm1, %v141_v32  ;;  %v1851_v31 = vsel %vm164_vm1, %v1156_v27, 0  ;;  %v1139_v32 = vld [vmem:[#allocation7 + $0x38] sm:$0xf] }
  0x99   :  { %2570 = vmatpush3.bf16.xpose.msra.mxu0 %v629_v33  ;;  %2576 = vmatpush3.bf16.xpose.msra.mxu1 %v675_v34  ;;  %v1140_v33 = vld [vmem:[#allocation7 + $0x3c] sm:$0xf] }
  0x9a   :  { %2571 = vmatprep.mubr.msk.bf16.mxu0 %vm3014_vm0, %v3013_v0  ;;  %2577 = vmatprep.mubr.msk.bf16.mxu1 %vm3014_vm0, %v3013_v0 }
  0x9b   :  { %2581 = vmatprep.subr.bf16.mxu0 %v3013_v0  ;;  %2587 = vmatprep.subr.bf16.mxu1 %v3013_v0 }
  0xa0   :  { %2572 = vmatmul.mubr.msk.bf16.vlgmr.msra.gmra.mrb[20].mxu0 %vm164_vm1, %v142_v37  ;;  %2578 = vmatmul.mubr.msk.bf16.vlgmr.msra.gmra.mrb[20].mxu1 %vm164_vm1, %v143_v38 }
  0xa1   :  { %2582 = vmatpush3.bf16.xpose.msra.mxu0 %v721_v39  ;;  %2588 = vmatpush3.bf16.xpose.msra.mxu1 %v767_v40 }
  0xa2   :  { %2583 = vmatprep.mubr.msk.bf16.mxu0 %vm3014_vm0, %v3013_v0  ;;  %2589 = vmatprep.mubr.msk.bf16.mxu1 %vm3014_vm0, %v3013_v0 }
  0xa3   :  { %2593 = vmatprep.subr.bf16.mxu0 %v3013_v0  ;;  %2599 = vmatprep.subr.bf16.mxu1 %v3013_v0 }
  0xa8   :  { %2584 = vmatmul.mubr.msk.bf16.vlgmr.msra.gmra.mrb[24].mxu0 %vm164_vm1, %v144_v43  ;;  %2590 = vmatmul.mubr.msk.bf16.vlgmr.msra.gmra.mrb[24].mxu1 %vm164_vm1, %v145_v44 }
  0xa9   :  { %2594 = vmatpush3.bf16.xpose.msra.mxu0 %v813_v45  ;;  %2600 = vmatpush3.bf16.xpose.msra.mxu1 %v859_v46 }
  0xaa   :  { %2595 = vmatprep.mubr.msk.bf16.mxu0 %vm3014_vm0, %v3013_v0  ;;  %2601 = vmatprep.mubr.msk.bf16.mxu1 %vm3014_vm0, %v3013_v0 }
  0xab   :  { %2605 = vmatprep.subr.bf16.mxu0 %v3013_v0  ;;  %2611 = vmatprep.subr.bf16.mxu1 %v3013_v0 }
  0xb0   :  { %2596 = vmatmul.mubr.msk.bf16.vlgmr.msra.gmra.mrb[28].mxu0 %vm164_vm1, %v146_v49  ;;  %2602 = vmatmul.mubr.msk.bf16.vlgmr.msra.gmra.mrb[28].mxu1 %vm164_vm1, %v147_v50 }
  0xb1   :  { %2606 = vmatpush3.bf16.xpose.msra.mxu0 %v1161_v51  ;;  %2612 = vmatpush3.bf16.xpose.msra.mxu1 %v1207_v52 }
  0xb2   :  { %2607 = vmatprep.mubr.msk.bf16.mxu0 %vm3014_vm0, %v3013_v0  ;;  %2613 = vmatprep.mubr.msk.bf16.mxu1 %vm3014_vm0, %v3013_v0 }
  0xb3   :  { %2617 = vmatprep.subr.bf16.mxu0 %v3013_v0  ;;  %2623 = vmatprep.subr.bf16.mxu1 %v3013_v0 }
  0xb8   :  { %2608 = vmatmul.mubr.msk.bf16.vlgmr.msra.gmra.mrb[32].mxu0 %vm164_vm1, %v1125_v55  ;;  %2614 = vmatmul.mubr.msk.bf16.vlgmr.msra.gmra.mrb[32].mxu1 %vm164_vm1, %v1126_v56 }
  0xb9   :  { %2618 = vmatpush3.bf16.xpose.msra.mxu0 %v1253_v57  ;;  %2624 = vmatpush3.bf16.xpose.msra.mxu1 %v1299_v58 }
  0xba   :  { %2619 = vmatprep.mubr.msk.bf16.mxu0 %vm3014_vm0, %v3013_v0  ;;  %2625 = vmatprep.mubr.msk.bf16.mxu1 %vm3014_vm0, %v3013_v0 }
  0xbb   :  { %2629 = vmatprep.subr.bf16.mxu0 %v3013_v0  ;;  %2635 = vmatprep.subr.bf16.mxu1 %v3013_v0 }
  0xc0   :  { %2620 = vmatmul.mubr.msk.bf16.vlgmr.msra.gmra.mrb[36].mxu0 %vm164_vm1, %v1127_v61  ;;  %2626 = vmatmul.mubr.msk.bf16.vlgmr.msra.gmra.mrb[36].mxu1 %vm164_vm1, %v1128_v62  ;;  %v2165_v62 = vlaneseq }
  0xc1   :  { %2630 = vmatpush3.bf16.xpose.msra.mxu0 %v1345_v63  ;;  %2636 = vmatpush3.bf16.xpose.msra.mxu1 %v1391_v1 }
  0xc2   :  { %2631 = vmatprep.mubr.msk.bf16.mxu0 %vm3014_vm0, %v3013_v0  ;;  %2637 = vmatprep.mubr.msk.bf16.mxu1 %vm3014_vm0, %v3013_v0 }
  0xc3   :  { %2641 = vmatprep.subr.bf16.mxu0 %v3013_v0  ;;  %2647 = vmatprep.subr.bf16.mxu1 %v3013_v0 }
  0xc8   :  { %2632 = vmatmul.mubr.msk.bf16.vlgmr.msra.gmra.mrb[40].mxu0 %vm164_vm1, %v1129_v4  ;;  %2638 = vmatmul.mubr.msk.bf16.vlgmr.msra.gmra.mrb[40].mxu1 %vm164_vm1, %v1130_v5 }
  0xc9   :  { %2642 = vmatpush3.bf16.xpose.msra.mxu0 %v1437_v6  ;;  %2648 = vmatpush3.bf16.xpose.msra.mxu1 %v1483_v7 }
  0xca   :  { %2643 = vmatprep.mubr.msk.bf16.mxu0 %vm3014_vm0, %v3013_v0  ;;  %2649 = vmatprep.mubr.msk.bf16.mxu1 %vm3014_vm0, %v3013_v0 }
  0xcb   :  { %2653 = vmatprep.subr.bf16.mxu0 %v3013_v0  ;;  %2659 = vmatprep.subr.bf16.mxu1 %v3013_v0 }
  0xd0   :  { %2644 = vmatmul.mubr.msk.bf16.vlgmr.msra.gmra.mrb[44].mxu0 %vm164_vm1, %v1131_v10  ;;  %2650 = vmatmul.mubr.msk.bf16.vlgmr.msra.gmra.mrb[44].mxu1 %vm164_vm1, %v1132_v11  ;;  %v3315_v11 = vshrl.u32 %v2165_v62, 7 }
  0xd1   :  { %2654 = vmatpush3.bf16.xpose.msra.mxu0 %v1529_v12  ;;  %2660 = vmatpush3.bf16.xpose.msra.mxu1 %v1575_v13 }
  0xd2   :  { %2655 = vmatprep.mubr.msk.bf16.mxu0 %vm3014_vm0, %v3013_v0  ;;  %2661 = vmatprep.mubr.msk.bf16.mxu1 %vm3014_vm0, %v3013_v0  ;;  %vm2171_vm2 = vcmp.lt.s32.totalorder %v3315_v11, 4 }
  0xd3   :  { %2665 = vmatprep.subr.bf16.mxu0 %v3013_v0  ;;  %2671 = vmatprep.subr.bf16.mxu1 %v3013_v0 }
  0xd8   :  { %2656 = vmatmul.mubr.msk.bf16.vlgmr.msra.gmra.mrb[48].mxu0 %vm164_vm1, %v1133_v16  ;;  %2662 = vmatmul.mubr.msk.bf16.vlgmr.msra.gmra.mrb[48].mxu1 %vm164_vm1, %v1134_v17 }
  0xd9   :  { %2666 = vmatpush3.bf16.xpose.msra.mxu0 %v1621_v18  ;;  %2672 = vmatpush3.bf16.xpose.msra.mxu1 %v1667_v19 }
  0xda   :  { %2667 = vmatprep.mubr.msk.bf16.mxu0 %vm3014_vm0, %v3013_v0  ;;  %2673 = vmatprep.mubr.msk.bf16.mxu1 %vm3014_vm0, %v3013_v0 }
  0xdb   :  { %2677 = vmatprep.subr.bf16.mxu0 %v3013_v0  ;;  %2683 = vmatprep.subr.bf16.mxu1 %v3013_v0 }
  0xe0   :  { %2668 = vmatmul.mubr.msk.bf16.vlgmr.msra.gmra.mrb[52].mxu0 %vm164_vm1, %v1135_v22  ;;  %2674 = vmatmul.mubr.msk.bf16.vlgmr.msra.gmra.mrb[52].mxu1 %vm164_vm1, %v1136_v23  ;;  %v2181_v22 = vsub.s32 0, %v3315_v11 }
  0xe1   :  { %2678 = vmatpush3.bf16.xpose.msra.mxu0 %v1713_v24  ;;  %2684 = vmatpush3.bf16.xpose.msra.mxu1 %v1759_v25 }
  0xe2   :  { %2679 = vmatprep.mubr.msk.bf16.mxu0 %vm3014_vm0, %v3013_v0  ;;  %2685 = vmatprep.mubr.msk.bf16.mxu1 %vm3014_vm0, %v3013_v0 }
  0xe3   :  { %2689 = vmatprep.subr.bf16.mxu0 %v3013_v0  ;;  %2695 = vmatprep.subr.bf16.mxu1 %v3013_v0 }
  0xe8   :  { %2680 = vmatmul.mubr.msk.bf16.vlgmr.msra.gmra.mrb[56].mxu0 %vm164_vm1, %v1137_v28  ;;  %2686 = vmatmul.mubr.msk.bf16.vlgmr.msra.gmra.mrb[56].mxu1 %vm164_vm1, %v1138_v29  ;;  %v3325_v29 = vsel %vm2171_vm2, 1.0, %v3013_v0 }
  0xe9   :  { %2690 = vmatpush3.bf16.xpose.msra.mxu0 %v1805_v30  ;;  %2696 = vmatpush3.bf16.xpose.msra.mxu1 %v1851_v31 }
  0xea   :  { %2691 = vmatprep.mubr.msk.bf16.mxu0 %vm3014_vm0, %v3013_v0  ;;  %2697 = vmatprep.mubr.msk.bf16.mxu1 %vm3014_vm0, %v3013_v0 }
  0xf0   :  { %2692 = vmatmul.mubr.msk.bf16.vlgmr.msra.gmra.mrb[60].mxu0 %vm164_vm1, %v1139_v32  ;;  %2698 = vmatmul.mubr.msk.bf16.vlgmr.msra.gmra.mrb[60].mxu1 %vm164_vm1, %v1140_v33 }
 0x14b   :  { %v205_v34 = vpop.f32.mrb[0].mxu0  ;;  %v251_v35 = vpop.f32.mrb[0].mxu1 }
 0x14c   :  { %v2394_v36 = vclamps-f32 %v205_v34, 10.0  ;;  %v2395_v37 = vclamps-f32 %v251_v35, 10.0  ;;  %v2513_v38 = vpop.f32.mrb[1].mxu0  ;;  %v2519_v39 = vpop.f32.mrb[1].mxu1  ;;  %v2185_v35 = vsub.s32 1, %v3315_v11 }
 0x14d   :  { %v208_v40 = vpop.f32.mrb[2].mxu0  ;;  %v254_v41 = vpop.f32.mrb[2].mxu1 }
 0x14e   :  { %v933_v42 = vsub.f32 0.0, %v2394_v36  ;;  %v934_v43 = vsub.f32 0.0, %v2395_v37  ;;  %v2514_v44 = vpop.f32.mrb[3].mxu0  ;;  %v2520_v45 = vpop.f32.mrb[3].mxu1 }
 0x150   :  { %v949_v46 = vmul.f32 1.442695, %v933_v42  ;;  %v951_v47 = vmul.f32 1.442695, %v934_v43  ;;  %v3337_v42 = vrot.slane %v3325_v29, %v2181_v22 }
 0x152   :  { %2712 = vpow2.f32 %v949_v46 }
 0x153   :  { %2714 = vpow2.f32 %v951_v47  ;;  %v297_v48 = vpop.f32.mrb[4].mxu0  ;;  %v343_v49 = vpop.f32.mrb[4].mxu1 }
 0x154   :  { %v2396_v50 = vclamps-f32 %v297_v48, 10.0  ;;  %v2397_v51 = vclamps-f32 %v343_v49, 10.0  ;;  %v2525_v52 = vpop.f32.mrb[5].mxu0  ;;  %v2531_v53 = vpop.f32.mrb[5].mxu1  ;;  %v3343_v48 = vrot.slane %v3325_v29, %v2185_v35  ;;  %v2189_v49 = vsub.s32 2, %v3315_v11 }
 0x155   :  { %v300_v54 = vpop.f32.mrb[6].mxu0  ;;  %v346_v55 = vpop.f32.mrb[6].mxu1  ;;  %v2193_v53 = vsub.s32 3, %v3315_v11 }
 0x156   :  { %v935_v56 = vsub.f32 0.0, %v2396_v50  ;;  %v936_v57 = vsub.f32 0.0, %v2397_v51  ;;  %v2526_v58 = vpop.f32.mrb[7].mxu0  ;;  %v2532_v59 = vpop.f32.mrb[7].mxu1 }
 0x158   :  { %v953_v60 = vmul.f32 1.442695, %v935_v56  ;;  %v955_v61 = vmul.f32 1.442695, %v936_v57 }
 0x15a   :  { %2716 = vpow2.f32 %v953_v60 }
 0x15b   :  { %2718 = vpow2.f32 %v955_v61  ;;  %v389_v63 = vpop.f32.mrb[8].mxu0  ;;  %v435_v1 = vpop.f32.mrb[8].mxu1 }
 0x15c   :  { %v3310_v2 = vpop.eup %2712  ;;  %v2398_v3 = vclamps-f32 %v389_v63, 10.0  ;;  %v2399_v4 = vclamps-f32 %v435_v1, 10.0  ;;  %v2537_v5 = vpop.f32.mrb[9].mxu0 }
 0x15d   :  { %v2543_v6 = vpop.f32.mrb[9].mxu1  ;;  %v3312_v7 = vpop.eup %2714  ;;  %v981_v10 = vadd.f32 1.0, %v3310_v2  ;;  %v984_v21 = vmul.f32 -0.5, %v3310_v2  ;;  %v987_v33 = vand.u32 2147483647, %v3310_v2 }
 0x15e   :  { %v392_v8 = vpop.f32.mrb[10].mxu0  ;;  %v438_v9 = vpop.f32.mrb[10].mxu1  ;;  %v937_v12 = vsub.f32 0.0, %v2398_v3  ;;  %v938_v13 = vsub.f32 0.0, %v2399_v4  ;;  %v990_v16 = vadd.f32 1.0, %v3312_v7  ;;  %v993_v28 = vmul.f32 -0.5, %v3312_v7 }
 0x15f   :  { %v2538_v14 = vpop.f32.mrb[11].mxu0  ;;  %v2544_v15 = vpop.f32.mrb[11].mxu1  ;;  %2720 = vlog2.f32 %v981_v10  ;;  %v985_v41 = vadd.f32 1.0, %v984_v21  ;;  %v996_v0 = vand.u32 2147483647, %v3312_v7 }
 0x160   :  { %v957_v17 = vmul.f32 1.442695, %v937_v12  ;;  %v959_v18 = vmul.f32 1.442695, %v938_v13  ;;  %2722 = vlog2.f32 %v990_v16  ;;  %v994_v45 = vadd.f32 1.0, %v993_v28 }
 0x161   :  { %vm3346_vm4 = vcmp.lt.f32.partialorder %v987_v33, 0.0004427343  ;;  %v986_v56 = vmul.f32 %v3310_v2, %v985_v41  ;;  %vm3352_vm5 = vcmp.lt.f32.partialorder %v996_v0, 0.0004427343 }
 0x162   :  { %2724 = vpow2.f32 %v957_v17  ;;  %v995_v1 = vmul.f32 %v3312_v7, %v994_v45  ;;  %v3372_v17 = vrot.slane %v3325_v29, %v2189_v49 }
 0x163   :  { %2726 = vpow2.f32 %v959_v18  ;;  %v481_v19 = vpop.f32.mrb[12].mxu0  ;;  %v527_v20 = vpop.f32.mrb[12].mxu1  ;;  %v3377_v18 = vrot.slane %v3325_v29, %v2193_v53 }
 0x164   :  { %v3321_v23 = vpop.eup %2716  ;;  %v2400_v24 = vclamps-f32 %v481_v19, 10.0  ;;  %v2401_v25 = vclamps-f32 %v527_v20, 10.0  ;;  %v2549_v26 = vpop.f32.mrb[13].mxu0  ;;  %v2197_v19 = vsub.s32 4, %v3315_v11 }
 0x165   :  { %v2555_v27 = vpop.f32.mrb[13].mxu1  ;;  %v3327_v30 = vpop.eup %2718  ;;  %v999_v34 = vadd.f32 1.0, %v3321_v23  ;;  %v1002_v47 = vmul.f32 -0.5, %v3321_v23  ;;  %v1005_v3 = vand.u32 2147483647, %v3321_v23 }
 0x166   :  { %v484_v31 = vpop.f32.mrb[14].mxu0  ;;  %v530_v32 = vpop.f32.mrb[14].mxu1  ;;  %v939_v36 = vsub.f32 0.0, %v2400_v24  ;;  %v940_v37 = vsub.f32 0.0, %v2401_v25  ;;  %v1008_v40 = vadd.f32 1.0, %v3327_v30  ;;  %v1011_v9 = vmul.f32 -0.5, %v3327_v30 }
 0x167   :  { %v2550_v38 = vpop.f32.mrb[15].mxu0  ;;  %v2556_v39 = vpop.f32.mrb[15].mxu1  ;;  %2728 = vlog2.f32 %v999_v34  ;;  %v1003_v8 = vadd.f32 1.0, %v1002_v47  ;;  %v2201_v24 = vsub.s32 5, %v3315_v11  ;;  %vm3381_vm6 = vcmp.lt.f32.partialorder %v1005_v3, 0.0004427343 }
 0x168   :  { %v961_v43 = vmul.f32 1.442695, %v939_v36  ;;  %v963_v44 = vmul.f32 1.442695, %v940_v37  ;;  %2730 = vlog2.f32 %v1008_v40  ;;  %v1014_v27 = vand.u32 2147483647, %v3327_v30 }
 0x169   :  { %v2721_v46 = vpop.eup %2720  ;;  %v1004_v34 = vmul.f32 %v3321_v23, %v1003_v8  ;;  %v1012_v36 = vadd.f32 1.0, %v1011_v9 }
 0x16a   :  { %v2723_v50 = vpop.eup %2722  ;;  %2732 = vpow2.f32 %v961_v43  ;;  %v983_v51 = vmul.f32 0.6931472, %v2721_v46  ;;  %vm3414_vm7 = vcmp.lt.f32.partialorder %v1014_v27, 0.0004427343 }
 0x16b   :  { %2734 = vpow2.f32 %v963_v44  ;;  %v573_v54 = vpop.f32.mrb[16].mxu0  ;;  %v619_v55 = vpop.f32.mrb[16].mxu1  ;;  %v992_v57 = vmul.f32 0.6931472, %v2723_v50  ;;  %v1013_v9 = vmul.f32 %v3327_v30, %v1012_v36 }
 0x16c   :  { %v3356_v59 = vpop.eup %2724  ;;  %v2402_v60 = vclamps-f32 %v573_v54, 10.0  ;;  %v2403_v61 = vclamps-f32 %v619_v55, 10.0  ;;  %v2561_v62 = vpop.f32.mrb[17].mxu0  ;;  %v989_v2 = vsel %vm3346_vm4, %v986_v56, %v983_v51 }
 0x16d   :  { %v2567_v63 = vpop.f32.mrb[17].mxu1  ;;  %v3360_v4 = vpop.eup %2726  ;;  %v1017_v10 = vadd.f32 1.0, %v3356_v59  ;;  %v998_v7 = vsel %vm3352_vm5, %v995_v1, %v992_v57  ;;  %v2259_v28 = vmul.f32 %v3337_v42, %v989_v2  ;;  %v1020_v39 = vmul.f32 -0.5, %v3356_v59 }
 0x16e   :  { %v576_v5 = vpop.f32.mrb[18].mxu0  ;;  %v622_v6 = vpop.f32.mrb[18].mxu1  ;;  %v941_v12 = vsub.f32 0.0, %v2402_v60  ;;  %v942_v13 = vsub.f32 0.0, %v2403_v61  ;;  %v1026_v16 = vadd.f32 1.0, %v3360_v4  ;;  %v2260_v31 = vmul.f32 %v3343_v48, %v998_v7 }
 0x16f   :  { %v2562_v14 = vpop.f32.mrb[19].mxu0  ;;  %v2568_v15 = vpop.f32.mrb[19].mxu1  ;;  %2736 = vlog2.f32 %v1017_v10  ;;  %v2292_v40 = vsel %vm2291_vm3, %v2259_v28, 0.0  ;;  %v1023_v47 = vand.u32 2147483647, %v3356_v59  ;;  %v1029_v55 = vmul.f32 -0.5, %v3360_v4 }
 0x170   :  { %v965_v20 = vmul.f32 1.442695, %v941_v12  ;;  %v967_v21 = vmul.f32 1.442695, %v942_v13  ;;  %2738 = vlog2.f32 %v1026_v16  ;;  %v2293_v41 = vsel %vm2291_vm3, %v2260_v31, 0.0 }
 0x171   :  { %v2729_v25 = vpop.eup %2728  ;;  %v2294_v50 = vadd.f32 %v2293_v41, %v2292_v40  ;;  %v3402_v57 = vrot.slane %v3325_v29, %v2197_v19  ;;  %v1021_v3 = vadd.f32 1.0, %v1020_v39  ;;  %v3410_v5 = vrot.slane %v3325_v29, %v2201_v24 }
 0x172   :  { %v2731_v32 = vpop.eup %2730  ;;  %2740 = vpow2.f32 %v965_v20  ;;  %v1001_v33 = vmul.f32 0.6931472, %v2729_v25  ;;  %v2205_v6 = vsub.s32 6, %v3315_v11  ;;  %vm3418_vm8 = vcmp.lt.f32.partialorder %v1023_v47, 0.0004427343 }
 0x173   :  { %2742 = vpow2.f32 %v967_v21  ;;  %v665_v37 = vpop.f32.mrb[20].mxu0  ;;  %v711_v38 = vpop.f32.mrb[20].mxu1  ;;  %v1010_v54 = vmul.f32 0.6931472, %v2731_v32  ;;  %v1032_v14 = vand.u32 2147483647, %v3360_v4  ;;  %v1022_v26 = vmul.f32 %v3356_v59, %v1021_v3 }
 0x174   :  { %v3392_v0 = vpop.eup %2732  ;;  %v2404_v43 = vclamps-f32 %v665_v37, 10.0  ;;  %v2405_v44 = vclamps-f32 %v711_v38, 10.0  ;;  %v2573_v45 = vpop.f32.mrb[21].mxu0  ;;  %v1007_v63 = vsel %vm3381_vm6, %v1004_v34, %v1001_v33  ;;  %v1030_v20 = vadd.f32 1.0, %v1029_v55 }
 0x175   :  { %v2579_v46 = vpop.f32.mrb[21].mxu1  ;;  %v3395_v23 = vpop.eup %2734  ;;  %v1035_v56 = vadd.f32 1.0, %v3392_v0  ;;  %v2261_v15 = vmul.f32 %v3372_v17, %v1007_v63  ;;  %v1016_v16 = vsel %vm3414_vm7, %v1013_v9, %v1010_v54  ;;  %v1038_v27 = vmul.f32 -0.5, %v3392_v0 }
 0x176   :  { %v668_v51 = vpop.f32.mrb[22].mxu0  ;;  %v714_v52 = vpop.f32.mrb[22].mxu1  ;;  %v943_v58 = vsub.f32 0.0, %v2404_v43  ;;  %v944_v60 = vsub.f32 0.0, %v2405_v44  ;;  %v1044_v1 = vadd.f32 1.0, %v3395_v23  ;;  %v2209_v44 = vsub.s32 7, %v3315_v11 }
 0x177   :  { %v2574_v61 = vpop.f32.mrb[23].mxu0  ;;  %v2580_v62 = vpop.f32.mrb[23].mxu1  ;;  %2744 = vlog2.f32 %v1035_v56  ;;  %v2295_v28 = vsel %vm2291_vm3, %v2261_v15, 0.0  ;;  %v1041_v37 = vand.u32 2147483647, %v3392_v0  ;;  %v2262_v45 = vmul.f32 %v3377_v18, %v1016_v16 }
 0x178   :  { %v969_v2 = vmul.f32 1.442695, %v943_v58  ;;  %v971_v8 = vmul.f32 1.442695, %v944_v60  ;;  %2746 = vlog2.f32 %v1044_v1  ;;  %v2296_v38 = vadd.f32 %v2295_v28, %v2294_v50 }
 0x179   :  { %v2737_v12 = vpop.eup %2736  ;;  %v1031_v55 = vmul.f32 %v3360_v4, %v1030_v20  ;;  %vm3441_vm9 = vcmp.lt.f32.partialorder %v1032_v14, 0.0004427343  ;;  %v1047_v58 = vmul.f32 -0.5, %v3395_v23  ;;  %v3449_v60 = vrot.slane %v3325_v29, %v2205_v6 }
 0x17a   :  { %v2739_v7 = vpop.eup %2738  ;;  %2748 = vpow2.f32 %v969_v2  ;;  %v1019_v30 = vmul.f32 0.6931472, %v2737_v12  ;;  %v1039_v63 = vadd.f32 1.0, %v1038_v27  ;;  %vm3451_vm10 = vcmp.lt.f32.partialorder %v1041_v37, 0.0004427343 }
 0x17b   :  { %2750 = vpow2.f32 %v971_v8  ;;  %v757_v21 = vpop.f32.mrb[24].mxu0  ;;  %v803_v25 = vpop.f32.mrb[24].mxu1  ;;  %v1028_v43 = vmul.f32 0.6931472, %v2739_v7  ;;  %v2297_v2 = vsel %vm2291_vm3, %v2262_v45, 0.0  ;;  %v1048_v15 = vadd.f32 1.0, %v1047_v58 }
 0x17c   :  { %v3429_v31 = vpop.eup %2740  ;;  %v2406_v32 = vclamps-f32 %v757_v21, 10.0  ;;  %v2407_v33 = vclamps-f32 %v803_v25, 10.0  ;;  %v2585_v34 = vpop.f32.mrb[25].mxu0  ;;  %v1025_v54 = vsel %vm3418_vm8, %v1022_v26, %v1019_v30  ;;  %v2298_v10 = vadd.f32 %v2297_v2, %v2296_v38 }
 0x17d   :  { %v2591_v36 = vpop.f32.mrb[25].mxu1  ;;  %v3432_v39 = vpop.eup %2742  ;;  %v1053_v59 = vadd.f32 1.0, %v3429_v31  ;;  %v2263_v4 = vmul.f32 %v3402_v57, %v1025_v54  ;;  %v1034_v8 = vsel %vm3441_vm9, %v1031_v55, %v1028_v43  ;;  %v1050_v7 = vand.u32 2147483647, %v3395_v23 }
 0x17e   :  { %v760_v40 = vpop.f32.mrb[26].mxu0  ;;  %v806_v41 = vpop.f32.mrb[26].mxu1  ;;  %v945_v46 = vsub.f32 0.0, %v2406_v32  ;;  %v946_v47 = vsub.f32 0.0, %v2407_v33  ;;  %v1062_v50 = vadd.f32 1.0, %v3432_v39  ;;  %v1040_v27 = vmul.f32 %v3392_v0, %v1039_v63 }
 0x17f   :  { %v2586_v51 = vpop.f32.mrb[27].mxu0  ;;  %v2592_v52 = vpop.f32.mrb[27].mxu1  ;;  %2752 = vlog2.f32 %v1053_v59  ;;  %v2299_v16 = vsel %vm2291_vm3, %v2263_v4, 0.0  ;;  %v1056_v36 = vmul.f32 -0.5, %v3429_v31  ;;  %v1059_v37 = vand.u32 2147483647, %v3429_v31 }
 0x180   :  { %v973_v61 = vmul.f32 1.442695, %v945_v46  ;;  %v975_v62 = vmul.f32 1.442695, %v946_v47  ;;  %2754 = vlog2.f32 %v1062_v50  ;;  %v2300_v28 = vadd.f32 %v2299_v16, %v2298_v10 }
 0x181   :  { %v2745_v1 = vpop.eup %2744  ;;  %v2264_v40 = vmul.f32 %v3410_v5, %v1034_v8  ;;  %v1065_v0 = vmul.f32 -0.5, %v3432_v39  ;;  %v1049_v52 = vmul.f32 %v3395_v23, %v1048_v15  ;;  %vm3475_vm11 = vcmp.lt.f32.partialorder %v1050_v7, 0.0004427343  ;;  %v3490_v23 = vld [vmem:[#allocation10] ss:$0 sm:$0xff] }
 0x182   :  { %2756 = vpow2.f32 %v973_v61  ;;  %v1037_v9 = vmul.f32 0.6931472, %v2745_v1  ;;  %v2747_v12 = vpop.eup %2746  ;;  %v3482_v50 = vrot.slane %v3325_v29, %v2209_v44  ;;  %v1057_v55 = vadd.f32 1.0, %v1056_v36 }
 0x183   :  { %2758 = vpow2.f32 %v975_v62  ;;  %v849_v13 = vpop.f32.mrb[28].mxu0  ;;  %v895_v14 = vpop.f32.mrb[28].mxu1  ;;  %v1046_v47 = vmul.f32 0.6931472, %v2747_v12  ;;  %vm3484_vm12 = vcmp.lt.f32.partialorder %v1059_v37, 0.0004427343 }
 0x184   :  { %v3461_v30 = vpop.eup %2748  ;;  %v2408_v20 = vclamps-f32 %v849_v13, 10.0  ;;  %v2409_v21 = vclamps-f32 %v895_v14, 10.0  ;;  %v2597_v25 = vpop.f32.mrb[29].mxu0  ;;  %v1043_v59 = vsel %vm3451_vm10, %v1040_v27, %v1037_v9  ;;  %v2301_v61 = vsel %vm2291_vm3, %v2264_v40, 0.0 }
 0x185   :  { %v2603_v26 = vpop.f32.mrb[29].mxu1  ;;  %v3464_v32 = vpop.eup %2750  ;;  %v1071_v38 = vadd.f32 1.0, %v3461_v30  ;;  %v2265_v58 = vmul.f32 %v3449_v60, %v1043_v59  ;;  %v1066_v63 = vadd.f32 1.0, %v1065_v0  ;;  %v1068_v1 = vand.u32 2147483647, %v3432_v39 }
 0x186   :  { %v852_v33 = vpop.f32.mrb[30].mxu0  ;;  %v898_v34 = vpop.f32.mrb[30].mxu1  ;;  %v1080_v45 = vadd.f32 1.0, %v3464_v32  ;;  %v947_v46 = vsub.f32 0.0, %v2408_v20  ;;  %v948_v51 = vsub.f32 0.0, %v2409_v21  ;;  %v2302_v3 = vadd.f32 %v2301_v61, %v2300_v28 }
 0x187   :  { %v2598_v41 = vpop.f32.mrb[31].mxu0  ;;  %v2604_v43 = vpop.f32.mrb[31].mxu1  ;;  %2760 = vlog2.f32 %v1071_v38  ;;  %v1052_v9 = vsel %vm3475_vm11, %v1049_v52, %v1046_v47  ;;  %v1074_v10 = vmul.f32 -0.5, %v3461_v30  ;;  %v2303_v12 = vsel %vm2291_vm3, %v2265_v58, 0.0  ;;  %v3502_v34 = vld [vmem:[#allocation13] sm:$0xff] }
 0x188   :  { %2762 = vlog2.f32 %v1080_v45  ;;  %v977_v29 = vmul.f32 1.442695, %v947_v46  ;;  %v979_v14 = vmul.f32 1.442695, %v948_v51  ;;  %v2304_v21 = vadd.f32 %v2303_v12, %v2302_v3 }
 0x189   :  { %v2753_v62 = vpop.eup %2752  ;;  %v3507_v36 = vrot.slane %v3502_v34, %v2181_v22  ;;  %v3512_v37 = vrot.slane %v3502_v34, %v2185_v35  ;;  %v2266_v0 = vmul.f32 %v3482_v50, %v1052_v9  ;;  %v1058_v45 = vmul.f32 %v3429_v31, %v1057_v55 }
 0x18a   :  { %v2755_v4 = vpop.eup %2754  ;;  %v1055_v28 = vmul.f32 0.6931472, %v2753_v62  ;;  %2764 = vpow2.f32 %v977_v29  ;;  %vm3519_vm13 = vcmp.lt.f32.partialorder %v1068_v1, 0.0004427343  ;;  %v1075_v46 = vadd.f32 1.0, %v1074_v10 }
 0x18b   :  { %v1197_v2 = vpop.f32.mrb[32].mxu0  ;;  %v1243_v8 = vpop.f32.mrb[32].mxu1  ;;  %v1064_v47 = vmul.f32 0.6931472, %v2755_v4  ;;  %v1067_v51 = vmul.f32 %v3432_v39, %v1066_v63  ;;  %v1077_v58 = vand.u32 2147483647, %v3461_v30 }
 0x18c   :  { %v3497_v13 = vpop.eup %2756  ;;  %v2426_v15 = vclamps-f32 %v1197_v2, 10.0  ;;  %v2427_v7 = vclamps-f32 %v1243_v8, 10.0  ;;  %v2609_v16 = vpop.f32.mrb[33].mxu0  ;;  %v1061_v54 = vsel %vm3484_vm12, %v1058_v45, %v1055_v28  ;;  %v1083_v61 = vmul.f32 -0.5, %v3464_v32 }
 0x18d   :  { %v2615_v20 = vpop.f32.mrb[33].mxu1  ;;  %v3499_v25 = vpop.eup %2758  ;;  %v1089_v33 = vadd.f32 1.0, %v3497_v13  ;;  %v2305_v62 = vsel %vm2291_vm3, %v2266_v0, 0.0  ;;  %v1076_v39 = vmul.f32 %v3461_v30, %v1075_v46  ;;  %v1086_v63 = vand.u32 2147483647, %v3464_v32 }
 0x18e   :  { %v1200_v26 = vpop.f32.mrb[34].mxu0  ;;  %v1246_v27 = vpop.f32.mrb[34].mxu1  ;;  %v1932_v38 = vmul.f32 %v3490_v23, %v2426_v15  ;;  %v1933_v40 = vmul.f32 %v3490_v23, %v2427_v7  ;;  %v1098_v59 = vadd.f32 1.0, %v3499_v25  ;;  %v2306_v29 = vadd.f32 %v2305_v62, %v2304_v21 }
 0x18f   :  { %v2610_v41 = vpop.f32.mrb[35].mxu0  ;;  %v2616_v43 = vpop.f32.mrb[35].mxu1  ;;  %2766 = vlog2.f32 %v1089_v33  ;;  %v1070_v12 = vsel %vm3519_vm13, %v1067_v51, %v1064_v47  ;;  %vm3534_vm14 = vcmp.lt.f32.partialorder %v1077_v58, 0.0004427343  ;;  %v1084_v30 = vadd.f32 1.0, %v1083_v61 }
 0x190   :  { %v1948_v35 = vsub.f32 0.0, %v1932_v38  ;;  %2768 = vpow2.f32 %v979_v14  ;;  %v1949_v31 = vsub.f32 0.0, %v1933_v40  ;;  %v2267_v14 = vmul.f32 %v3507_v36, %v1061_v54 }
 0x191   :  { %v2761_v52 = vpop.eup %2760  ;;  %2770 = vlog2.f32 %v1098_v59  ;;  %v1092_v20 = vmul.f32 -0.5, %v3497_v13  ;;  %v3542_v21 = vrot.slane %v3502_v34, %v2189_v49  ;;  %v1101_v40 = vmul.f32 -0.5, %v3499_v25 }
 0x192   :  { %v1073_v55 = vmul.f32 0.6931472, %v2761_v52  ;;  %v1964_v1 = vmul.f32 1.442695, %v1948_v35  ;;  %v2763_v2 = vpop.eup %2762  ;;  %v1966_v26 = vmul.f32 1.442695, %v1949_v31  ;;  %v2268_v59 = vmul.f32 %v3512_v37, %v1070_v12 }
 0x193   :  { %v1289_v3 = vpop.f32.mrb[36].mxu0  ;;  %v1335_v4 = vpop.f32.mrb[36].mxu1  ;;  %v1082_v43 = vmul.f32 0.6931472, %v2763_v2  ;;  %vm3550_vm15 = vcmp.lt.f32.partialorder %v1086_v63, 0.0004427343  ;;  %v3557_v49 = vrot.slane %v3502_v34, %v2193_v53  ;;  %v1085_v35 = vmul.f32 %v3464_v32, %v1084_v30 }
 0x194   :  { %v2428_v56 = vclamps-f32 %v1289_v3, 10.0  ;;  %v2429_v8 = vclamps-f32 %v1335_v4, 10.0  ;;  %v2621_v9 = vpop.f32.mrb[37].mxu0  ;;  %v2627_v10 = vpop.f32.mrb[37].mxu1  ;;  %v1079_v38 = vsel %vm3534_vm14, %v1076_v39, %v1073_v55  ;;  %2772 = vpow2.f32 %v1964_v1 }
 0x195   :  { %v1292_v15 = vpop.f32.mrb[38].mxu0  ;;  %v1338_v7 = vpop.f32.mrb[38].mxu1  ;;  %v2307_v45 = vsel %vm2291_vm3, %v2267_v14, 0.0  ;;  %v1095_v47 = vand.u32 2147483647, %v3497_v13  ;;  %v2269_v51 = vmul.f32 %v3542_v21, %v1079_v38  ;;  %2774 = vpow2.f32 %v1966_v26 }
 0x196   :  { %v1934_v27 = vmul.f32 %v3490_v23, %v2428_v56  ;;  %v2622_v28 = vpop.f32.mrb[39].mxu0  ;;  %v2628_v33 = vpop.f32.mrb[39].mxu1  ;;  %v1935_v41 = vmul.f32 %v3490_v23, %v2429_v8  ;;  %v1093_v54 = vadd.f32 1.0, %v1092_v20  ;;  %v1102_v58 = vadd.f32 1.0, %v1101_v40 }
 0x197   :  { %v3560_v22 = vpop.eup %2764  ;;  %v1104_v61 = vand.u32 2147483647, %v3499_v25  ;;  %v1088_v1 = vsel %vm3550_vm15, %v1085_v35, %v1082_v43  ;;  %v2308_v3 = vadd.f32 %v2307_v45, %v2306_v29  ;;  %v2309_v32 = vsel %vm2291_vm3, %v2268_v59, 0.0 }
 0x198   :  { %v1950_v46 = vsub.f32 0.0, %v1934_v27  ;;  %v1951_v53 = vsub.f32 0.0, %v1935_v41  ;;  %v1107_v8 = vadd.f32 1.0, %v3560_v22  ;;  %v2311_v9 = vsel %vm2291_vm3, %v2269_v51, 0.0 }
 0x199   :  { %v2767_v52 = vpop.eup %2766  ;;  %v2310_v7 = vadd.f32 %v2309_v32, %v2308_v3  ;;  %v2270_v27 = vmul.f32 %v3557_v49, %v1088_v1  ;;  %v1094_v33 = vmul.f32 %v3497_v13, %v1093_v54  ;;  %vm3578_vm0 = vcmp.lt.f32.partialorder %v1095_v47, 0.0004427343 }
 0x19a   :  { %v3566_v31 = vpop.eup %2768  ;;  %v1968_v10 = vmul.f32 1.442695, %v1950_v46  ;;  %v1091_v15 = vmul.f32 0.6931472, %v2767_v52  ;;  %v1970_v28 = vmul.f32 1.442695, %v1951_v53  ;;  %2776 = vlog2.f32 %v1107_v8 }
 0x19b   :  { %v1381_v55 = vpop.f32.mrb[40].mxu0  ;;  %v1427_v62 = vpop.f32.mrb[40].mxu1  ;;  %v1116_v26 = vadd.f32 1.0, %v3566_v31  ;;  %v2312_v40 = vadd.f32 %v2311_v9, %v2310_v7  ;;  %v3585_v43 = vrot.slane %v3502_v34, %v2197_v19  ;;  %v3590_v59 = vrot.slane %v3502_v34, %v2201_v24 }
 0x19c   :  { %v2771_v4 = vpop.eup %2770  ;;  %v2430_v39 = vclamps-f32 %v1381_v55, 10.0  ;;  %v2431_v63 = vclamps-f32 %v1427_v62, 10.0  ;;  %v2633_v2 = vpop.f32.mrb[41].mxu0  ;;  %2778 = vpow2.f32 %v1968_v10  ;;  %v1097_v45 = vsel %vm3578_vm0, %v1094_v33, %v1091_v15 }
 0x19d   :  { %v2639_v56 = vpop.f32.mrb[41].mxu1  ;;  %v1384_v12 = vpop.f32.mrb[42].mxu0  ;;  %v1100_v38 = vmul.f32 0.6931472, %v2771_v4  ;;  %v1103_v46 = vmul.f32 %v3499_v25, %v1102_v58  ;;  %vm3597_vm1 = vcmp.lt.f32.partialorder %v1104_v61, 0.0004427343  ;;  %2780 = vlog2.f32 %v1116_v26 }
 0x19e   :  { %v1430_v14 = vpop.f32.mrb[42].mxu1  ;;  %v1936_v16 = vmul.f32 %v3490_v23, %v2430_v39  ;;  %v1937_v29 = vmul.f32 %v3490_v23, %v2431_v63  ;;  %v2634_v30 = vpop.f32.mrb[43].mxu0  ;;  %v2313_v19 = vsel %vm2291_vm3, %v2270_v27, 0.0  ;;  %2782 = vpow2.f32 %v1970_v28 }
 0x19f   :  { %v2640_v20 = vpop.f32.mrb[43].mxu1  ;;  %v3592_v0 = vpop.eup %2772  ;;  %v1106_v52 = vsel %vm3597_vm1, %v1103_v46, %v1100_v38  ;;  %v1110_v54 = vmul.f32 -0.5, %v3560_v22  ;;  %v2314_v53 = vadd.f32 %v2313_v19, %v2312_v40  ;;  %v2271_v3 = vmul.f32 %v3585_v43, %v1097_v45 }
 0x1a0   :  { %v1952_v13 = vsub.f32 0.0, %v1936_v16  ;;  %v1953_v35 = vsub.f32 0.0, %v1937_v29  ;;  %v3605_v55 = vpop.eup %2774  ;;  %v1996_v1 = vadd.f32 1.0, %v3592_v0  ;;  %v1113_v10 = vand.u32 2147483647, %v3560_v22 }
 0x1a1   :  { %v1111_v12 = vadd.f32 1.0, %v1110_v54  ;;  %v2005_v14 = vadd.f32 1.0, %v3605_v55  ;;  %v3616_v15 = vrot.slane %v3502_v34, %v2205_v6  ;;  %v2272_v7 = vmul.f32 %v3590_v59, %v1106_v52 }
 0x1a2   :  { %v1972_v32 = vmul.f32 1.442695, %v1952_v13  ;;  %v1974_v63 = vmul.f32 1.442695, %v1953_v35  ;;  %2784 = vlog2.f32 %v1996_v1  ;;  %v2315_v30 = vsel %vm2291_vm3, %v2271_v3, 0.0 }
 0x1a3   :  { %v1473_v24 = vpop.f32.mrb[44].mxu0  ;;  %v1519_v51 = vpop.f32.mrb[44].mxu1  ;;  %v1119_v20 = vmul.f32 -0.5, %v3566_v31  ;;  %v1122_v26 = vand.u32 2147483647, %v3566_v31  ;;  %v3625_v27 = vrot.slane %v3502_v34, %v2209_v44  ;;  %v3634_v45 = vmul.f32 %v3560_v22, %v1111_v12 }
 0x1a4   :  { %v2432_v25 = vclamps-f32 %v1473_v24, 10.0  ;;  %v2433_v58 = vclamps-f32 %v1519_v51, 10.0  ;;  %v2645_v61 = vpop.f32.mrb[45].mxu0  ;;  %v2651_v62 = vpop.f32.mrb[45].mxu1  ;;  %2786 = vpow2.f32 %v1972_v32  ;;  %vm3627_vm2 = vcmp.lt.f32.partialorder %v1113_v10, 0.0004427343 }
 0x1a5   :  { %v1476_v4 = vpop.f32.mrb[46].mxu0  ;;  %v1522_v39 = vpop.f32.mrb[46].mxu1  ;;  %2788 = vpow2.f32 %v1974_v63  ;;  %v1999_v11 = vmul.f32 -0.5, %v3592_v0  ;;  %v2008_v44 = vmul.f32 -0.5, %v3605_v55  ;;  %v2316_v46 = vadd.f32 %v2315_v30, %v2314_v53 }
 0x1a6   :  { %v1938_v2 = vmul.f32 %v3490_v23, %v2432_v25  ;;  %v1939_v56 = vmul.f32 %v3490_v23, %v2433_v58  ;;  %v2646_v8 = vpop.f32.mrb[47].mxu0  ;;  %v2652_v9 = vpop.f32.mrb[47].mxu1  ;;  %2790 = vlog2.f32 %v2005_v14  ;;  %v2317_v52 = vsel %vm2291_vm3, %v2272_v7, 0.0 }
 0x1a7   :  { %v2777_v28 = vpop.eup %2776  ;;  %v1120_v22 = vadd.f32 1.0, %v1119_v20  ;;  %v2002_v61 = vand.u32 2147483647, %v3592_v0  ;;  %v3642_v62 = vadd.f32 %v2317_v52, %v2316_v46  ;;  %v2011_v10 = vand.u32 2147483647, %v3605_v55 }
 0x1a8   :  { %v1954_v16 = vsub.f32 0.0, %v1938_v2  ;;  %v1955_v29 = vsub.f32 0.0, %v1939_v56  ;;  %v3631_v40 = vpop.eup %2778  ;;  %v1109_v39 = vmul.f32 0.6931472, %v2777_v28  ;;  %v2000_v2 = vadd.f32 1.0, %v1999_v11 }
 0x1a9   :  { %v2781_v35 = vpop.eup %2780  ;;  %v2014_v4 = vadd.f32 1.0, %v3631_v40  ;;  %v2009_v56 = vadd.f32 1.0, %v2008_v44  ;;  %v1121_v14 = vmul.f32 %v3566_v31, %v1120_v22  ;;  %vm3650_vm4 = vcmp.lt.f32.partialorder %v1122_v26, 0.0004427343 }
 0x1aa   :  { %v1976_v6 = vmul.f32 1.442695, %v1954_v16  ;;  %v1978_v33 = vmul.f32 1.442695, %v1955_v29  ;;  %v3639_v54 = vpop.eup %2782  ;;  %v1118_v63 = vmul.f32 0.6931472, %v2781_v35  ;;  %v1115_v26 = vsel %vm3627_vm2, %v3634_v45, %v1109_v39 }
 0x1ab   :  { %v1565_v41 = vpop.f32.mrb[48].mxu0  ;;  %v1611_v13 = vpop.f32.mrb[48].mxu1  ;;  %v2023_v12 = vadd.f32 1.0, %v3639_v54  ;;  %v2017_v16 = vmul.f32 -0.5, %v3631_v40  ;;  %v2026_v29 = vmul.f32 -0.5, %v3639_v54  ;;  %v3668_v11 = vmul.f32 %v3592_v0, %v2000_v2 }
 0x1ac   :  { %v2434_v47 = vclamps-f32 %v1565_v41, 10.0  ;;  %v2435_v19 = vclamps-f32 %v1611_v13, 10.0  ;;  %v2657_v24 = vpop.f32.mrb[49].mxu0  ;;  %v2663_v51 = vpop.f32.mrb[49].mxu1  ;;  %2792 = vpow2.f32 %v1976_v6  ;;  %vm3656_vm5 = vcmp.lt.f32.partialorder %v2002_v61, 0.0004427343 }
 0x1ad   :  { %v1568_v25 = vpop.f32.mrb[50].mxu0  ;;  %v1614_v58 = vpop.f32.mrb[50].mxu1  ;;  %2794 = vpow2.f32 %v1978_v33  ;;  %v1124_v13 = vsel %vm3650_vm4, %v1121_v14, %v1118_v63  ;;  %v3671_v44 = vmul.f32 %v3605_v55, %v2009_v56  ;;  %vm3675_vm6 = vcmp.lt.f32.partialorder %v2011_v10, 0.0004427343 }
 0x1ae   :  { %v1940_v53 = vmul.f32 %v3490_v23, %v2434_v47  ;;  %v1941_v1 = vmul.f32 %v3490_v23, %v2435_v19  ;;  %v2658_v3 = vpop.f32.mrb[51].mxu0  ;;  %v2664_v32 = vpop.f32.mrb[51].mxu1  ;;  %2796 = vlog2.f32 %v2014_v4  ;;  %v2018_v52 = vadd.f32 1.0, %v2017_v16 }
 0x1af   :  { %v2785_v30 = vpop.eup %2784  ;;  %2798 = vlog2.f32 %v2023_v12  ;;  %v2020_v0 = vand.u32 2147483647, %v3631_v40  ;;  %v2027_v25 = vadd.f32 1.0, %v2026_v29  ;;  %v2273_v39 = vmul.f32 %v3616_v15, %v1115_v26  ;;  %v3710_v26 = vld [vmem:[#allocation11] ss:$0 sm:$0xff] }
 0x1b0   :  { %v1956_v8 = vsub.f32 0.0, %v1940_v53  ;;  %v1957_v9 = vsub.f32 0.0, %v1941_v1  ;;  %v3660_v33 = vpop.eup %2786  ;;  %v1998_v32 = vmul.f32 0.6931472, %v2785_v30  ;;  %v3688_v63 = vmul.f32 %v3625_v27, %v1124_v13 }
 0x1b1   :  { %v3673_v46 = vpop.eup %2788  ;;  %v2032_v1 = vadd.f32 1.0, %v3660_v33  ;;  %v2035_v10 = vmul.f32 -0.5, %v3660_v33  ;;  %v3695_v14 = vmul.f32 %v3631_v40, %v2018_v52  ;;  %v3698_v7 = vmul.f32 %v3639_v54, %v2027_v25 }
 0x1b2   :  { %v1980_v20 = vmul.f32 1.442695, %v1956_v8  ;;  %v1982_v28 = vmul.f32 1.442695, %v1957_v9  ;;  %v2791_v55 = vpop.eup %2790  ;;  %v2041_v4 = vadd.f32 1.0, %v3673_v46  ;;  %v2044_v16 = vmul.f32 -0.5, %v3673_v46 }
 0x1b3   :  { %v1657_v41 = vpop.f32.mrb[52].mxu0  ;;  %v1703_v31 = vpop.f32.mrb[52].mxu1  ;;  %v2029_v9 = vand.u32 2147483647, %v3639_v54  ;;  %v2007_v12 = vmul.f32 0.6931472, %v2791_v55  ;;  %v2004_v40 = vsel %vm3656_vm5, %v3668_v11, %v1998_v32 }
 0x1b4   :  { %v2436_v35 = vclamps-f32 %v1657_v41, 10.0  ;;  %v2437_v47 = vclamps-f32 %v1703_v31, 10.0  ;;  %v2669_v19 = vpop.f32.mrb[53].mxu0  ;;  %v2675_v24 = vpop.f32.mrb[53].mxu1  ;;  %2800 = vpow2.f32 %v1980_v20  ;;  %vm3701_vm7 = vcmp.lt.f32.partialorder %v2020_v0, 0.0004427343 }
 0x1b5   :  { %v1660_v38 = vpop.f32.mrb[54].mxu0  ;;  %v1706_v45 = vpop.f32.mrb[54].mxu1  ;;  %2802 = vpow2.f32 %v1982_v28  ;;  %v3713_v13 = vsel %vm2291_vm3, %v2273_v39, 0.0  ;;  %vm3715_vm8 = vcmp.lt.f32.partialorder %v2029_v9, 0.0004427343  ;;  %v2036_v6 = vadd.f32 1.0, %v2035_v10 }
 0x1b6   :  { %v1942_v58 = vmul.f32 %v3490_v23, %v2436_v35  ;;  %v1943_v22 = vmul.f32 %v3490_v23, %v2437_v47  ;;  %v2670_v61 = vpop.f32.mrb[55].mxu0  ;;  %v2676_v53 = vpop.f32.mrb[55].mxu1  ;;  %2804 = vlog2.f32 %v2032_v1  ;;  %v2013_v0 = vsel %vm3675_vm6, %v3671_v44, %v2007_v12 }
 0x1b7   :  { %v3683_v3 = vpop.eup %2792  ;;  %2806 = vlog2.f32 %v2041_v4  ;;  %v2038_v25 = vand.u32 2147483647, %v3660_v33  ;;  %v2045_v32 = vadd.f32 1.0, %v2044_v16  ;;  %v2147_v44 = vmul.f32 %v3710_v26, %v2004_v40 }
 0x1b8   :  { %v3690_v2 = vpop.eup %2794  ;;  %v1958_v56 = vsub.f32 0.0, %v1942_v58  ;;  %v1959_v8 = vsub.f32 0.0, %v1943_v22  ;;  %v2050_v28 = vadd.f32 1.0, %v3683_v3  ;;  %v2053_v55 = vmul.f32 -0.5, %v3683_v3 }
 0x1b9   :  { %v2059_v54 = vadd.f32 1.0, %v3690_v2  ;;  %v2797_v35 = vpop.eup %2796  ;;  %v3733_v10 = vmul.f32 %v3660_v33, %v2036_v6  ;;  %v2148_v12 = vmul.f32 %v3710_v26, %v2013_v0  ;;  %vm3738_vm9 = vcmp.lt.f32.partialorder %v2038_v25, 0.0004427343 }
 0x1ba   :  { %v1984_v29 = vmul.f32 1.442695, %v1958_v56  ;;  %v1986_v30 = vmul.f32 1.442695, %v1959_v8  ;;  %v2799_v58 = vpop.eup %2798  ;;  %v2016_v39 = vmul.f32 0.6931472, %v2797_v35  ;;  %v3743_v40 = vmul.f32 %v3673_v46, %v2045_v32 }
 0x1bb   :  { %v1749_v41 = vpop.f32.mrb[56].mxu0  ;;  %v1795_v31 = vpop.f32.mrb[56].mxu1  ;;  %v2047_v56 = vand.u32 2147483647, %v3673_v46  ;;  %v2054_v16 = vadd.f32 1.0, %v2053_v55  ;;  %v3759_v20 = vmul.f32 %v3343_v48, %v2148_v12 }
 0x1bc   :  { %2808 = vpow2.f32 %v1984_v29  ;;  %v2438_v47 = vclamps-f32 %v1749_v41, 10.0  ;;  %v2439_v19 = vclamps-f32 %v1795_v31, 10.0  ;;  %v2681_v24 = vpop.f32.mrb[57].mxu0  ;;  %v2687_v38 = vpop.f32.mrb[57].mxu1  ;;  %v2025_v29 = vmul.f32 0.6931472, %v2799_v58 }
 0x1bd   :  { %2810 = vpow2.f32 %v1986_v30  ;;  %v1752_v11 = vpop.f32.mrb[58].mxu0  ;;  %v1798_v52 = vpop.f32.mrb[58].mxu1  ;;  %v2056_v30 = vand.u32 2147483647, %v3683_v3  ;;  %vm3749_vm10 = vcmp.lt.f32.partialorder %v2047_v56, 0.0004427343 }
 0x1be   :  { %v1944_v22 = vmul.f32 %v3490_v23, %v2438_v47  ;;  %v1945_v61 = vmul.f32 %v3490_v23, %v2439_v19  ;;  %v2682_v53 = vpop.f32.mrb[59].mxu0  ;;  %v2688_v1 = vpop.f32.mrb[59].mxu1  ;;  %2812 = vlog2.f32 %v2050_v28  ;;  %v2062_v28 = vmul.f32 -0.5, %v3690_v2 }
 0x1bf   :  { %v3726_v4 = vpop.eup %2800  ;;  %2814 = vlog2.f32 %v2059_v54  ;;  %v2022_v19 = vsel %vm3701_vm7, %v3695_v14, %v2016_v39  ;;  %v2065_v38 = vand.u32 2147483647, %v3690_v2  ;;  %v3756_v11 = vmul.f32 %v3337_v42, %v2147_v44 }
 0x1c0   :  { %v3730_v51 = vpop.eup %2802  ;;  %v1960_v8 = vsub.f32 0.0, %v1944_v22  ;;  %v1961_v9 = vsub.f32 0.0, %v1945_v61  ;;  %v2068_v33 = vadd.f32 1.0, %v3726_v4  ;;  %v2031_v61 = vsel %vm3715_vm8, %v3698_v7, %v2025_v29 }
 0x1c1   :  { %v2077_v6 = vadd.f32 1.0, %v3730_v51  ;;  %v2805_v46 = vpop.eup %2804  ;;  %v3765_v42 = vmul.f32 %v3683_v3, %v2054_v16  ;;  %v2063_v53 = vadd.f32 1.0, %v2062_v28  ;;  %vm3771_vm11 = vcmp.lt.f32.partialorder %v2056_v30, 0.0004427343 }
 0x1c2   :  { %v1988_v41 = vmul.f32 1.442695, %v1960_v8  ;;  %v1990_v31 = vmul.f32 1.442695, %v1961_v9  ;;  %v2807_v14 = vpop.eup %2806  ;;  %v2071_v45 = vmul.f32 -0.5, %v3726_v4 }
 0x1c3   :  { %v1841_v35 = vpop.f32.mrb[60].mxu0  ;;  %v1887_v47 = vpop.f32.mrb[60].mxu1  ;;  %v2034_v3 = vmul.f32 0.6931472, %v2805_v46  ;;  %vm3778_vm12 = vcmp.lt.f32.partialorder %v2065_v38, 0.0004427343 }
 0x1c4   :  { %2816 = vpow2.f32 %v1988_v41  ;;  %v2440_v52 = vclamps-f32 %v1841_v35, 10.0  ;;  %v2441_v0 = vclamps-f32 %v1887_v47, 10.0  ;;  %v2693_v25 = vpop.f32.mrb[61].mxu0  ;;  %v2699_v55 = vpop.f32.mrb[61].mxu1  ;;  %v2043_v30 = vmul.f32 0.6931472, %v2807_v14 }
 0x1c5   :  { %2818 = vpow2.f32 %v1990_v31  ;;  %v1844_v58 = vpop.f32.mrb[62].mxu0  ;;  %v1890_v22 = vpop.f32.mrb[62].mxu1  ;;  %v2064_v31 = vmul.f32 %v3690_v2, %v2063_v53  ;;  %v2080_v35 = vmul.f32 -0.5, %v3730_v51  ;;  %v2150_v47 = vmul.f32 %v3710_v26, %v2031_v61 }
 0x1c6   :  { %v3767_v1 = vpop.eup %2808  ;;  %v1946_v32 = vmul.f32 %v3490_v23, %v2440_v52  ;;  %v1947_v39 = vmul.f32 %v3490_v23, %v2441_v0  ;;  %v2694_v48 = vpop.f32.mrb[63].mxu0  ;;  %2820 = vlog2.f32 %v2068_v33  ;;  %v2149_v23 = vmul.f32 %v3710_v26, %v2022_v19 }
 0x1c7   :  { %v2700_v56 = vpop.f32.mrb[63].mxu1  ;;  %v3776_v7 = vpop.eup %2810  ;;  %2822 = vlog2.f32 %v2077_v6  ;;  %v2086_v9 = vadd.f32 1.0, %v3767_v1  ;;  %v2074_v33 = vand.u32 2147483647, %v3726_v4  ;;  %v2072_v46 = vadd.f32 1.0, %v2071_v45 }
 0x1c8   :  { %v2813_v12 = vpop.eup %2812  ;;  %v1962_v29 = vsub.f32 0.0, %v1946_v32  ;;  %v1963_v16 = vsub.f32 0.0, %v1947_v39  ;;  %v2095_v28 = vadd.f32 1.0, %v3776_v7  ;;  %v2040_v19 = vsel %vm3738_vm9, %v3733_v10, %v2034_v3 }
 0x1c9   :  { %v2815_v41 = vpop.eup %2814  ;;  %2824 = vlog2.f32 %v2086_v9  ;;  %v2052_v52 = vmul.f32 0.6931472, %v2813_v12  ;;  %v2083_v0 = vand.u32 2147483647, %v3730_v51  ;;  %v2049_v2 = vsel %vm3749_vm10, %v3743_v40, %v2043_v30 }
 0x1ca   :  { %v1992_v38 = vmul.f32 1.442695, %v1962_v29  ;;  %v1994_v6 = vmul.f32 1.442695, %v1963_v16  ;;  %2826 = vlog2.f32 %v2095_v28  ;;  %v2061_v25 = vmul.f32 0.6931472, %v2815_v41 }
 0x1cb   :  { %v2320_v55 = vadd.f32 %v3713_v13, %v3642_v62  ;;  %v2089_v14 = vmul.f32 -0.5, %v3767_v1  ;;  %v2277_v58 = vmul.f32 %v3372_v17, %v2149_v23  ;;  %v2278_v10 = vmul.f32 %v3377_v18, %v2150_v47 }
 0x1cc   :  { %2828 = vpow2.f32 %v1992_v38  ;;  %v2073_v22 = vmul.f32 %v3726_v4, %v2072_v46  ;;  %vm3804_vm13 = vcmp.lt.f32.partialorder %v2074_v33, 0.0004427343  ;;  %v2081_v40 = vadd.f32 1.0, %v2080_v35 }
 0x1cd   :  { %2830 = vpow2.f32 %v1994_v6  ;;  %v2098_v24 = vmul.f32 -0.5, %v3776_v7  ;;  %v2058_v62 = vsel %vm3771_vm11, %v3765_v42, %v2052_v52  ;;  %vm3814_vm14 = vcmp.lt.f32.partialorder %v2083_v0, 0.0004427343 }
 0x1ce   :  { %v3801_v54 = vpop.eup %2816  ;;  %v2151_v13 = vmul.f32 %v3710_v26, %v2040_v19  ;;  %v2152_v4 = vmul.f32 %v3710_v26, %v2049_v2  ;;  %v2067_v39 = vsel %vm3778_vm12, %v2064_v31, %v2061_v25  ;;  %v2323_v56 = vsel %vm2291_vm3, %v3756_v11, 0.0 }
 0x1cf   :  { %v3809_v53 = vpop.eup %2818  ;;  %v2104_v18 = vadd.f32 1.0, %v3801_v54  ;;  %v2324_v42 = vsel %vm2291_vm3, %v3759_v20, 0.0  ;;  %v2090_v45 = vadd.f32 1.0, %v2089_v14  ;;  %v2092_v3 = vand.u32 2147483647, %v3767_v1 }
 0x1d0   :  { %v2821_v32 = vpop.eup %2820  ;;  %v2113_v48 = vadd.f32 1.0, %v3809_v53  ;;  %v2101_v9 = vand.u32 2147483647, %v3776_v7  ;;  %v2099_v23 = vadd.f32 1.0, %v2098_v24  ;;  %v2153_v8 = vmul.f32 %v3710_v26, %v2058_v62 }
 0x1d1   :  { %v2823_v44 = vpop.eup %2822  ;;  %2832 = vlog2.f32 %v2104_v18  ;;  %v2321_v12 = vsel %vm2291_vm3, %v3688_v63, 0.0  ;;  %v2070_v29 = vmul.f32 0.6931472, %v2821_v32  ;;  %v2082_v11 = vmul.f32 %v3730_v51, %v2081_v40 }
 0x1d2   :  { %2834 = vlog2.f32 %v2113_v48  ;;  %v2322_v16 = vadd.f32 %v2321_v12, %v2320_v55  ;;  %v2325_v30 = vadd.f32 %v2324_v42, %v2323_v56  ;;  %v2079_v28 = vmul.f32 0.6931472, %v2823_v44 }
 0x1d3   :  { %v2825_v20 = vpop.eup %2824  ;;  %v2154_v41 = vmul.f32 %v3710_v26, %v2067_v39  ;;  %v2279_v31 = vmul.f32 %v3402_v57, %v2151_v13  ;;  %v2326_v33 = vsel %vm2291_vm3, %v2277_v58, 0.0  ;;  %vm3837_vm15 = vcmp.lt.f32.partialorder %v2092_v3, 0.0004427343 }
 0x1d4   :  { %v2827_v35 = vpop.eup %2826  ;;  %v2107_v63 = vmul.f32 -0.5, %v3801_v54  ;;  %v2280_v38 = vmul.f32 %v3410_v5, %v2152_v4  ;;  %v2327_v51 = vadd.f32 %v2326_v33, %v2325_v30  ;;  %v2091_v46 = vmul.f32 %v3767_v1, %v2090_v45 }
 0x1d5   :  { %v2100_v19 = vmul.f32 %v3776_v7, %v2099_v23  ;;  %vm3847_vm0 = vcmp.lt.f32.partialorder %v2101_v9, 0.0004427343  ;;  %v2281_v52 = vmul.f32 %v3449_v60, %v2153_v8  ;;  %v2076_v2 = vsel %vm3804_vm13, %v2073_v22, %v2070_v29 }
 0x1d6   :  { %v3843_v6 = vpop.eup %2828  ;;  %v2088_v25 = vmul.f32 0.6931472, %v2825_v20  ;;  %v2110_v5 = vand.u32 2147483647, %v3801_v54  ;;  %v2085_v1 = vsel %vm3814_vm14, %v2082_v11, %v2079_v28  ;;  %v2116_v7 = vmul.f32 -0.5, %v3809_v53 }
 0x1d7   :  { %v2831_v0 = vpop.eup %2830  ;;  %v2122_v55 = vadd.f32 1.0, %v3843_v6  ;;  %v2282_v58 = vmul.f32 %v3482_v50, %v2154_v41  ;;  %v2097_v40 = vmul.f32 0.6931472, %v2827_v35  ;;  %v2108_v24 = vadd.f32 1.0, %v2107_v63 }
 0x1d8   :  { %v2131_v14 = vadd.f32 1.0, %v2831_v0  ;;  %v2119_v60 = vand.u32 2147483647, %v3809_v53  ;;  %v2155_v22 = vmul.f32 %v3710_v26, %v2076_v2  ;;  %v2328_v61 = vsel %vm2291_vm3, %v2278_v10, 0.0 }
 0x1d9   :  { %2836 = vlog2.f32 %v2122_v55  ;;  %v2330_v62 = vsel %vm2291_vm3, %v2279_v31, 0.0  ;;  %v2094_v17 = vsel %vm3837_vm15, %v2091_v46, %v2088_v25  ;;  %vm3866_vm1 = vcmp.lt.f32.partialorder %v2110_v5, 0.0004427343 }
 0x1da   :  { %2838 = vlog2.f32 %v2131_v14  ;;  %v2156_v50 = vmul.f32 %v3710_v26, %v2085_v1  ;;  %v2329_v4 = vadd.f32 %v2328_v61, %v2327_v51  ;;  %v2117_v48 = vadd.f32 1.0, %v2116_v7 }
 0x1db   :  { %v2833_v18 = vpop.eup %2832  ;;  %v2125_v56 = vmul.f32 -0.5, %v3843_v6  ;;  %v2355_v10 = vadd.f32 %v3502_v34, %v2322_v16  ;;  %v2103_v42 = vsel %vm3847_vm0, %v2100_v19, %v2097_v40  ;;  %v2109_v44 = vmul.f32 %v3801_v54, %v2108_v24 }
 0x1dc   :  { %v2835_v32 = vpop.eup %2834  ;;  %v2106_v39 = vmul.f32 0.6931472, %v2833_v18  ;;  %v2134_v45 = vmul.f32 -0.5, %v2831_v0  ;;  %v2331_v3 = vadd.f32 %v2330_v62, %v2329_v4  ;;  %v2157_v9 = vmul.f32 %v3710_v26, %v2094_v17 }
 0x1dd   :  { %v2283_v23 = vmul.f32 %v3507_v36, %v2155_v22  ;;  %v2332_v8 = vsel %vm2291_vm3, %v2280_v38, 0.0  ;;  %v2334_v12 = vsel %vm2291_vm3, %v2281_v52, 0.0  ;;  %2356 = vst.msk [vmem:[#allocation13] sm:$0xff] %vm2291_vm3, %v2355_v10  ;;  %v2115_v29 = vmul.f32 0.6931472, %v2835_v32 }
 0x1de   :  { %v2112_v34 = vsel %vm3866_vm1, %v2109_v44, %v2106_v39  ;;  %v2128_v11 = vand.u32 2147483647, %v3843_v6  ;;  %v2333_v16 = vadd.f32 %v2332_v8, %v2331_v3  ;;  %vm3884_vm2 = vcmp.lt.f32.partialorder %v2119_v60, 0.0004427343 }
 0x1df   :  { %v2126_v30 = vadd.f32 1.0, %v2125_v56  ;;  %v2137_v20 = vand.u32 2147483647, %v2831_v0  ;;  %v2158_v36 = vmul.f32 %v3710_v26, %v2103_v42  ;;  %v2118_v28 = vmul.f32 %v3809_v53, %v2117_v48 }
 0x1e0   :  { %v2135_v41 = vadd.f32 1.0, %v2134_v45  ;;  %v2284_v31 = vmul.f32 %v3512_v37, %v2156_v50  ;;  %v2335_v33 = vadd.f32 %v2334_v12, %v2333_v16  ;;  %v2159_v35 = vmul.f32 %v3710_v26, %v2112_v34 }
 0x1e1   :  { %v2285_v47 = vmul.f32 %v3542_v21, %v2157_v9  ;;  %v2336_v63 = vsel %vm2291_vm3, %v2282_v58, 0.0  ;;  %v2338_v38 = vsel %vm2291_vm3, %v2283_v23, 0.0  ;;  %v2121_v46 = vsel %vm3884_vm2, %v2118_v28, %v2115_v29 }
 0x1e2   :  { %vm3897_vm4 = vcmp.lt.f32.partialorder %v2128_v11, 0.0004427343  ;;  %v2337_v53 = vadd.f32 %v2336_v63, %v2335_v33  ;;  %v2127_v52 = vmul.f32 %v3843_v6, %v2126_v30  ;;  %vm2138_vm5 = vcmp.lt.f32.partialorder %v2137_v20, 0.0004427343 }
 0x1e3   :  { %v2837_v51 = vpop.eup %2836  ;;  %v2286_v21 = vmul.f32 %v3557_v49, %v2158_v36  ;;  %v2136_v25 = vmul.f32 %v2831_v0, %v2135_v41  ;;  %v2340_v55 = vsel %vm2291_vm3, %v2284_v31, 0.0  ;;  %v2160_v7 = vmul.f32 %v3710_v26, %v2121_v46 }
 0x1e4   :  { %v2839_v57 = vpop.eup %2838  ;;  %v2124_v37 = vmul.f32 0.6931472, %v2837_v51  ;;  %v2339_v5 = vadd.f32 %v2338_v38, %v2337_v53  ;;  %v2287_v14 = vmul.f32 %v3585_v43, %v2159_v35  ;;  %v2342_v58 = vsel %vm2291_vm3, %v2285_v47, 0.0 }
 0x1e5   :  { %v2133_v2 = vmul.f32 0.6931472, %v2839_v57  ;;  %v2344_v49 = vsel %vm2291_vm3, %v2286_v21, 0.0  ;;  %v2288_v22 = vmul.f32 %v3590_v59, %v2160_v7  ;;  %v2357_v59 = vld [vmem:[#allocation13] sm:$0xff] }
 0x1e6   :  { %v2130_v1 = vsel %vm3897_vm4, %v2127_v52, %v2124_v37  ;;  %v2341_v24 = vadd.f32 %v2340_v55, %v2339_v5  ;;  %v2346_v62 = vsel %vm2291_vm3, %v2287_v14, 0.0 }
 0x1e7   :  { %v2139_v40 = vsel %vm2138_vm5, %v2136_v25, %v2133_v2  ;;  %v2161_v6 = vmul.f32 %v3710_v26, %v2130_v1  ;;  %v2348_v13 = vsel %vm2291_vm3, %v2288_v22, 0.0 }
 0x1e8   :  { %v2343_v60 = vadd.f32 %v2342_v58, %v2341_v24  ;;  %v2162_v0 = vmul.f32 %v3710_v26, %v2139_v40 }
 0x1e9   :  { %v2289_v61 = vmul.f32 %v3616_v15, %v2161_v6 }
 0x1ea   :  { %v2345_v18 = vadd.f32 %v2344_v49, %v2343_v60  ;;  %v2290_v43 = vmul.f32 %v3625_v27, %v2162_v0 }
 0x1eb   :  { %v2350_v50 = vsel %vm2291_vm3, %v2289_v61, 0.0 }
 0x1ec   :  { %v2347_v17 = vadd.f32 %v2346_v62, %v2345_v18  ;;  %v2352_v39 = vsel %vm2291_vm3, %v2290_v43, 0.0 }
 0x1ee   :  { %v2349_v4 = vadd.f32 %v2348_v13, %v2347_v17 }
 0x1f0   :  { %v2351_v32 = vadd.f32 %v2350_v50, %v2349_v4 }
 0x1f2   :  { %v2353_v26 = vadd.f32 %v2352_v39, %v2351_v32 }
 0x1f4   :  { %v2358_v48 = vadd.f32 %v2357_v59, %v2353_v26 }
 0x1f6   :  { %2359 = vst.msk [vmem:[#allocation13] sm:$0xff] %vm2291_vm3, %v2358_v48 }
 0x1f7   :  { %2984 = shalt.err (!%p2981_p10)
}
 0x1f8   :  { %s2985_s22 = scalar_lea.hbm %s3938_s6, 128 }
 0x1f9   :  { %p2986_p11 = scmp.ne.s32.totalorder %s3938_s6, %s2985_s22  ;;  %p2989_p12 = scmp.lt.u32.totalorder %s2985_s22, %s3938_s6 }
 0x1fb   :  { %p2991_p13 = pnand %p2989_p12, %p2986_p11 }
 0x1fd   :  { %2994 = shalt.err (!%p2991_p13)
}
 0x1fe   :  { %2369 = dma.vmem_to_hbm [thread:$0]  %s2367_s20, 128, %s3938_s6, [#allocation4]  }
 0x1ff   :  { %3003 = dma.done.wait [#allocation4], 128  }
 0x200   :  { %3004 = vsyncadd [#allocation4], 4294967168 }
 0x201   :  { %2373 = vsyncpa [#allocation3], 1 }
 0x202   :  { %2374 = vsyncpa [#allocation6], 1 }
 0x203   :  { %2375 = vsyncpa [#allocation9], 1 }
 0x204   :  { %2376 = vsyncpa [#allocation12], 1 }
 0x205   :  { %2377 = vsyncpa [#allocation4], 1 }

</bundles_post_ra>
